<compile_context>
chip_gen: v6e
topology: v6e:2x2x1
jax: 0.10.0
libtpu: 0.0.40
codegen_flags: <defaults>
</compile_context>

<pallas_src>
import functools

import jax
import jax.numpy as jnp
from jax.experimental import pallas as pl
from jax.experimental.pallas import tpu as pltpu


# ----------------------------------------------------------------------------
# Kernel helpers
# ----------------------------------------------------------------------------
def _layernorm(z, g, b, eps):
    mu = jnp.mean(z, axis=-1, keepdims=True)
    var = jnp.mean(jnp.square(z - mu), axis=-1, keepdims=True)
    return (z - mu) * jax.lax.rsqrt(var + eps) * g + b


# ----------------------------------------------------------------------------
# Fused kernel: token build + depth transformer blocks + RLE head
# ----------------------------------------------------------------------------
def _fused_head_kernel(
    # resident inputs (constant block index across the depth axis)
    ptok_ref, kpt0_ref,
    # per-layer params (streamed along grid axis 1)
    g1_ref, b1_ref,
    wqkv_ref, bqkv_ref,
    wo_ref, bo_ref,
    g2_ref, b2_ref,
    w1_ref, bb1_ref, w2_ref, bb2_ref,
    # final-layer head params
    hg_ref, hb_ref, hw_ref, hbias_ref,
    # outputs (resident across depth; written on the last layer)
    pred_ref, kpt_out_ref, vis_out_ref,
    # scratch: token accumulator + attention context, persist across steps
    tok_ref, ctx_ref,
    *, heads, k_pad, k_real, eps,
):
    l = pl.program_id(1)
    n_layers = pl.num_programs(1)
    NB, T, D = tok_ref.shape
    dh = D // heads
    scale = dh ** -0.5

    # ---------------- layer 0: build the token sequence ----------------------
    @pl.when(l == 0)
    def _build_tokens():
        tok_ref[:, k_pad:, :] = ptok_ref[...].astype(jnp.float32)
        tok_ref[:, :k_pad, :] = jnp.broadcast_to(
            kpt0_ref[...], (NB, k_pad, D)).astype(jnp.float32)

    # ---------------- transformer encoder block `l` ---------------------------
    x = tok_ref[...]                                                # (NB, T, D) fp32

    # --- multi-head self-attention (pre-LN), fused QKV projection ---
    xn = _layernorm(x, g1_ref[0], b1_ref[0], eps)
    xnf = xn.reshape(NB * T, D).astype(jnp.bfloat16)
    qkv = jnp.dot(xnf, wqkv_ref[0],
                  preferred_element_type=jnp.float32) + bqkv_ref[0]  # (NB*T, 3D)

    # additive key mask for padded keypoint tokens (static; skipped if no pad)
    if k_pad > k_real:
        col = jax.lax.broadcasted_iota(jnp.int32, (1, 1, T), 2)
        key_bias = jnp.where((col >= k_real) & (col < k_pad),
                             jnp.float32(-1e30), jnp.float32(0.0))
    else:
        key_bias = None

    for h in range(heads):                       # static loop; heads is small
        lo = h * dh
        qh = qkv[:, lo:lo + dh].reshape(NB, T, dh).astype(jnp.bfloat16)
        kh = qkv[:, D + lo:D + lo + dh].reshape(NB, T, dh).astype(jnp.bfloat16)
        vh = qkv[:, 2 * D + lo:2 * D + lo + dh].reshape(NB, T, dh).astype(jnp.bfloat16)
        s = jnp.einsum("bqd,bkd->bqk", qh, kh,
                       preferred_element_type=jnp.float32) * scale   # (NB, T, T)
        if key_bias is not None:
            s = s + key_bias
        s = s - jnp.max(s, axis=-1, keepdims=True)
        p = jnp.exp(s)
        p = p * pl.reciprocal(jnp.sum(p, axis=-1, keepdims=True), approx=True)
        ho = jnp.einsum("bqk,bkd->bqd", p.astype(jnp.bfloat16), vh,
                        preferred_element_type=jnp.float32)          # (NB, T, dh)
        ctx_ref[:, :, lo:lo + dh] = ho           # short live range; no vreg acc

    # single fused output projection (contraction K = heads*dh = D)
    attn = jnp.dot(ctx_ref[...].reshape(NB * T, D).astype(jnp.bfloat16),
                   wo_ref[0], preferred_element_type=jnp.float32) + bo_ref[0]
    x = x + attn.reshape(NB, T, D)

    # --- MLP (pre-LN) ---
    xn2 = _layernorm(x, g2_ref[0], b2_ref[0], eps)
    h1 = jnp.dot(xn2.reshape(NB * T, D).astype(jnp.bfloat16), w1_ref[0],
                 preferred_element_type=jnp.float32) + bb1_ref[0]
    # TODO(synk): torch nn.GELU() is exact erf; tanh-approx GELU used here.
    h1 = jax.nn.gelu(h1)
    h2 = jnp.dot(h1.astype(jnp.bfloat16), w2_ref[0],
                 preferred_element_type=jnp.float32) + bb2_ref[0]
    x = x + h2.reshape(NB, T, D)
    tok_ref[...] = x

    # ---------------- last layer: token outputs + RLE regression head --------
    @pl.when(l == n_layers - 1)
    def _finalize():
        kpt = x[:, :k_pad, :]                                        # (NB, Kp, D)
        vis = x[:, k_pad:, :]                                        # (NB, P, D)
        kpt_out_ref[...] = kpt.astype(kpt_out_ref.dtype)
        vis_out_ref[...] = vis.astype(vis_out_ref.dtype)
        kn = _layernorm(kpt.reshape(NB * k_pad, D), hg_ref[...], hb_ref[...], eps)
        pred = jnp.dot(kn.astype(jnp.bfloat16), hw_ref[...],
                       preferred_element_type=jnp.float32) + hbias_ref[...]
        pred_ref[...] = pred.reshape(NB, k_pad, hw_ref.shape[-1])


# ----------------------------------------------------------------------------
# Module (parameter container + forward glue)
# ----------------------------------------------------------------------------
class RLESDPoseHeadPallas:
    def __init__(self, in_channels, num_joints, feature_size, patch_size,
                 dim, depth, heads, mlp_ratio, hidden_dim, seed=0):
        assert dim % heads == 0
        self.in_channels = in_channels
        self.num_joints = num_joints
        self.k_pad = ((num_joints + 7) // 8) * 8      # sublane-aligned kpt tokens
        self.feature_size = feature_size
        self.patch_size = patch_size
        self.dim = dim
        self.depth = depth
        self.heads = heads
        self.mlp_dim = int(dim * mlp_ratio)
        # TODO(synk): hidden_dim (original two-layer mlp_head) and SDPose
        # multi-cycle self-distillation re-entry are not reproduced.
        self.hidden_dim = hidden_dim

        H, W = feature_size
        p1, p2 = patch_size
        assert H % p1 == 0 and W % p2 == 0
        self.num_patches = (H // p1) * (W // p2)
        self.patch_dim = in_channels * p1 * p2

        # --- chip-aware VMEM budget / core count (perf review) ---
        try:
            info = pltpu.get_tpu_info()
            vmem_cap = int(getattr(info, "vmem_capacity_bytes", 64 * 1024 * 1024))
            cores = int(getattr(info, "num_cores",
                                getattr(info, "tensorcores_per_chip", 1)))
        except Exception:
            vmem_cap, cores = 64 * 1024 * 1024, 1
        self._vmem_limit = int(min(0.75 * vmem_cap, 100 * 1024 * 1024))
        self._num_cores = max(1, cores)

        D, mlp, K_pad = dim, self.mlp_dim, self.k_pad

        key = jax.random.PRNGKey(seed)
        keys = iter(jax.random.split(key, 8 + 4 * depth))

        def normal(k, shape, std=0.02):
            return std * jax.random.normal(k, shape, dtype=jnp.float32)

        # patch embedding (runs in the XLA wrapper so the raw fp32 patches are
        # never resident in VMEM across the depth loop)
        self.w_patch = normal(next(keys), (self.patch_dim, D)).astype(jnp.bfloat16)
        self.b_patch = jnp.zeros((1, D), jnp.float32)
        self.pos_emb = normal(next(keys), (1, self.num_patches, D))
        kpt0 = normal(next(keys), (1, num_joints, D))
        self.kpt_token = jnp.pad(kpt0, ((0, 0), (0, K_pad - num_joints), (0, 0)))

        # per-layer params, stacked on a leading depth axis (streamed per layer)
        wqkv, wo, w1, w2 = [], [], [], []
        for _ in range(depth):
            wqkv.append(normal(next(keys), (D, 3 * D)))   # fused [Wq|Wk|Wv]
            wo.append(normal(next(keys), (D, D)))
            w1.append(normal(next(keys), (D, mlp)))
            w2.append(normal(next(keys), (mlp, D)))
        self.wqkv = jnp.stack(wqkv).astype(jnp.bfloat16)  # (depth, D, 3D)
        self.wo = jnp.stack(wo).astype(jnp.bfloat16)      # (depth, D, D)
        self.w1 = jnp.stack(w1).astype(jnp.bfloat16)      # (depth, D, mlp)
        self.w2 = jnp.stack(w2).astype(jnp.bfloat16)      # (depth, mlp, D)
        self.bqkv = jnp.zeros((depth, 1, 3 * D), jnp.float32)   # lane-dense
        self.bo = jnp.zeros((depth, 1, D), jnp.float32)
        self.b1 = jnp.zeros((depth, 1, mlp), jnp.float32)
        self.b2 = jnp.zeros((depth, 1, D), jnp.float32)
        self.ln1_g = jnp.ones((depth, 1, D), jnp.float32)
        self.ln1_b = jnp.zeros((depth, 1, D), jnp.float32)
        self.ln2_g = jnp.ones((depth, 1, D), jnp.float32)
        self.ln2_b = jnp.zeros((depth, 1, D), jnp.float32)

        # RLE regression head: LayerNorm + Linear(dim, 4) (x, y, sigma_x, sigma_y)
        self.head_g = jnp.ones((1, D), jnp.float32)
        self.head_b = jnp.zeros((1, D), jnp.float32)
        self.head_w = normal(next(keys), (D, 4), std=0.001).astype(jnp.bfloat16)
        self.head_bias = jnp.zeros((1, 4), jnp.float32)

        self._forward = jax.jit(self._forward_impl)

    # ------------------------------------------------------------------
    def _pick_batch_block(self, n, target_rows=512):
        """Largest divisor of n that fits the VMEM budget and target MXU rows;
        on multi-core chips prefer an even number of batch-grid steps."""
        D, mlp, K_pad, P = self.dim, self.mlp_dim, self.k_pad, self.num_patches
        T = K_pad + P
        budget = int(0.6 * self._vmem_limit)

        def est_bytes(nb):
            scratch = 2 * nb * T * D * 4                       # tok + ctx
            pin = 2 * nb * P * D * 2                           # ptok (bf16, dbl buf)
            pout = 2 * (nb * K_pad * 4 * 4 + nb * K_pad * D * 2 + nb * P * D * 2)
            wts = 2 * (2 * (3 * D * D + D * D + 2 * D * mlp)   # bf16 weights, dbl buf
                       + 4 * (3 * D + 6 * D + 2 * mlp))
            fixed = K_pad * D * 4 + 8 * D + 32
            return scratch + pin + pout + wts + fixed

        divisors = [d for d in range(1, n + 1) if n % d == 0]
        fitting = [d for d in divisors
                   if d * T <= target_rows and est_bytes(d) <= budget]
        if not fitting:
            fitting = [1]
        if self._num_cores > 1:
            pref = [d for d in fitting if (n // d) % self._num_cores == 0]
            if pref:
                return max(pref)
        return max(fitting)

    # ------------------------------------------------------------------
    def _forward_impl(self, x):
        N, C, H, W = x.shape
        p1, p2 = self.patch_size
        P = self.num_patches
        K = self.num_joints
        K_pad = self.k_pad
        D = self.dim
        T = K_pad + P
        pd = self.patch_dim
        mlp = self.mlp_dim

        # rearrange 'b c (h p1) (w p2) -> b (h w) (p1 p2 c)' + patch embed + pos
        # (done with XLA so the raw fp32 patches are not VMEM-resident)
        xp = x.reshape(N, C, H // p1, p1, W // p2, p2)
        xp = xp.transpose(0, 2, 4, 3, 5, 1).reshape(N, P, pd)
        emb = jnp.dot(xp.astype(jnp.bfloat16), self.w_patch,
                      preferred_element_type=jnp.float32) + self.b_patch
        ptok = (emb + self.pos_emb).astype(jnp.bfloat16)        # (N, P, D) bf16

        NB = self._pick_batch_block(N)
        grid = (N // NB, self.depth)

        def fixed(shape):
            return pl.BlockSpec(shape, lambda b, l: (0,) * len(shape))

        def per_batch(shape):
            return pl.BlockSpec(shape, lambda b, l: (b,) + (0,) * (len(shape) - 1))

        def per_layer(shape):
            return pl.BlockSpec(shape, lambda b, l: (l,) + (0,) * (len(shape) - 1))

        in_specs = [
            per_batch((NB, P, D)),                              # patch tokens (bf16)
            fixed((1, K_pad, D)),                               # keypoint tokens
            per_layer((1, 1, D)), per_layer((1, 1, D)),         # LN1
            per_layer((1, D, 3 * D)), per_layer((1, 1, 3 * D)), # fused QKV
            per_layer((1, D, D)), per_layer((1, 1, D)),         # out proj
            per_layer((1, 1, D)), per_layer((1, 1, D)),         # LN2
            per_layer((1, D, mlp)), per_layer((1, 1, mlp)),     # MLP fc1
            per_layer((1, mlp, D)), per_layer((1, 1, D)),       # MLP fc2
            fixed((1, D)), fixed((1, D)), fixed((D, 4)), fixed((1, 4)),  # head
        ]
        out_specs = (
            per_batch((NB, K_pad, 4)),
            per_batch((NB, K_pad, D)),
            per_batch((NB, P, D)),
        )
        out_shape = (
            jax.ShapeDtypeStruct((N, K_pad, 4), jnp.float32),
            jax.ShapeDtypeStruct((N, K_pad, D), jnp.bfloat16),
            jax.ShapeDtypeStruct((N, P, D), jnp.bfloat16),
        )

        kernel = functools.partial(
            _fused_head_kernel, heads=self.heads, k_pad=K_pad, k_real=K, eps=1e-5)

        pred, kpt_token, vis_token = pl.pallas_call(
            kernel,
            out_shape=out_shape,
            grid=grid,
            in_specs=in_specs,
            out_specs=out_specs,
            scratch_shapes=[pltpu.VMEM((NB, T, D), jnp.float32),   # tokens
                            pltpu.VMEM((NB, T, D), jnp.float32)],  # attn context
            compiler_params=pltpu.CompilerParams(
                dimension_semantics=("parallel", "arbitrary"),
                vmem_limit_bytes=self._vmem_limit),
        )(
            ptok, self.kpt_token,
            self.ln1_g, self.ln1_b,
            self.wqkv, self.bqkv,
            self.wo, self.bo,
            self.ln2_g, self.ln2_b,
            self.w1, self.b1, self.w2, self.b2,
            self.head_g, self.head_b, self.head_w, self.head_bias,
        )
        # strip keypoint-token padding
        return {"pred": pred[:, :K],
                "kpt_token": kpt_token[:, :K],
                "vis_token": vis_token}

    def __call__(self, x):
        """x: (N, C, H, W) float32 (NCHW, like PyTorch)."""
        return self._forward(x)


# ----------------------------------------------------------------------------
# Main
# ----------------------------------------------------------------------------
if __name__ == "__main__":
    # small synthetic config
    N, C = 2, 4
    feature_size = (16, 16)
    patch_size = (4, 4)
    num_joints = 8
    dim, depth, heads, mlp_ratio, hidden_dim = 32, 2, 4, 2, 64

    head = RLESDPoseHeadPallas(
        in_channels=C, num_joints=num_joints,
        feature_size=feature_size, patch_size=patch_size,
        dim=dim, depth=depth, heads=heads,
        mlp_ratio=mlp_ratio, hidden_dim=hidden_dim, seed=0)

    key = jax.random.PRNGKey(0)
    x = jax.random.normal(key, (N, C, *feature_size), dtype=jnp.float32)

    out = head(x)
    jax.block_until_ready(out)

    assert out["pred"].shape == (N, num_joints, 4)
    assert out["kpt_token"].shape == (N, num_joints, dim)
    assert out["vis_token"].shape == (N, head.num_patches, dim)
    assert all(bool(jnp.all(jnp.isfinite(v.astype(jnp.float32))))
               for v in out.values())
    print("KERNEL_OK")
</pallas_src>

<mosaic_0001>
module attributes {stable_mosaic.version = 11 : i64} {
  func.func @_fused_head_kernel(%arg0: i32, %arg1: i32, %arg2: memref<2x16x32xbf16, #tpu.memory_space<vmem>>, %arg3: memref<1x8x32xf32, #tpu.memory_space<vmem>>, %arg4: memref<1x1x32xf32, #tpu.memory_space<vmem>>, %arg5: memref<1x1x32xf32, #tpu.memory_space<vmem>>, %arg6: memref<1x32x96xbf16, #tpu.memory_space<vmem>>, %arg7: memref<1x1x96xf32, #tpu.memory_space<vmem>>, %arg8: memref<1x32x32xbf16, #tpu.memory_space<vmem>>, %arg9: memref<1x1x32xf32, #tpu.memory_space<vmem>>, %arg10: memref<1x1x32xf32, #tpu.memory_space<vmem>>, %arg11: memref<1x1x32xf32, #tpu.memory_space<vmem>>, %arg12: memref<1x32x64xbf16, #tpu.memory_space<vmem>>, %arg13: memref<1x1x64xf32, #tpu.memory_space<vmem>>, %arg14: memref<1x64x32xbf16, #tpu.memory_space<vmem>>, %arg15: memref<1x1x32xf32, #tpu.memory_space<vmem>>, %arg16: memref<1x32xf32, #tpu.memory_space<vmem>>, %arg17: memref<1x32xf32, #tpu.memory_space<vmem>>, %arg18: memref<32x4xbf16, #tpu.memory_space<vmem>>, %arg19: memref<1x4xf32, #tpu.memory_space<vmem>>, %arg20: memref<2x8x4xf32, #tpu.memory_space<vmem>>, %arg21: memref<2x8x32xbf16, #tpu.memory_space<vmem>>, %arg22: memref<2x16x32xbf16, #tpu.memory_space<vmem>>, %arg23: memref<2x24x32xf32, #tpu.memory_space<vmem>>, %arg24: memref<2x24x32xf32, #tpu.memory_space<vmem>>) attributes {dimension_semantics = [#tpu.dimension_semantics<parallel>, #tpu.dimension_semantics<arbitrary>], iteration_bounds = array<i64: 1, 2>, scalar_prefetch = 0 : i64, scratch_operands = 2 : i64, tpu.core_type = #tpu.core_type<tc>, window_params = [{transform_indices = @transform_0, window_bounds = array<i64: 2, 16, 32>}, {pipeline_mode = #tpu.pipeline_mode<synchronous>, transform_indices = @transform_1, window_bounds = array<i64: 1, 8, 32>}, {transform_indices = @transform_2, window_bounds = array<i64: 1, 1, 32>}, {transform_indices = @transform_3, window_bounds = array<i64: 1, 1, 32>}, {transform_indices = @transform_4, window_bounds = array<i64: 1, 32, 96>}, {transform_indices = @transform_5, window_bounds = array<i64: 1, 1, 96>}, {transform_indices = @transform_6, window_bounds = array<i64: 1, 32, 32>}, {transform_indices = @transform_7, window_bounds = array<i64: 1, 1, 32>}, {transform_indices = @transform_8, window_bounds = array<i64: 1, 1, 32>}, {transform_indices = @transform_9, window_bounds = array<i64: 1, 1, 32>}, {transform_indices = @transform_10, window_bounds = array<i64: 1, 32, 64>}, {transform_indices = @transform_11, window_bounds = array<i64: 1, 1, 64>}, {transform_indices = @transform_12, window_bounds = array<i64: 1, 64, 32>}, {transform_indices = @transform_13, window_bounds = array<i64: 1, 1, 32>}, {pipeline_mode = #tpu.pipeline_mode<synchronous>, transform_indices = @transform_14, window_bounds = array<i64: 1, 32>}, {pipeline_mode = #tpu.pipeline_mode<synchronous>, transform_indices = @transform_15, window_bounds = array<i64: 1, 32>}, {pipeline_mode = #tpu.pipeline_mode<synchronous>, transform_indices = @transform_16, window_bounds = array<i64: 32, 4>}, {pipeline_mode = #tpu.pipeline_mode<synchronous>, transform_indices = @transform_17, window_bounds = array<i64: 1, 4>}, {transform_indices = @transform_18, window_bounds = array<i64: 2, 8, 4>}, {transform_indices = @transform_19, window_bounds = array<i64: 2, 8, 32>}, {transform_indices = @transform_20, window_bounds = array<i64: 2, 16, 32>}]} {
    %c0_i32 = arith.constant 0 : i32
    %0 = arith.cmpi eq, %arg1, %c0_i32 : i32
    %1 = arith.extui %0 : i1 to i32
    %c0_i32_0 = arith.constant 0 : i32
    %2 = arith.cmpi ne, %1, %c0_i32_0 : i32
    scf.if %2 {
      %c0_92 = arith.constant 0 : index
      %c0_93 = arith.constant 0 : index
      %c0_94 = arith.constant 0 : index
      %217 = vector.load %arg2[%c0_92, %c0_93, %c0_94] : memref<2x16x32xbf16, #tpu.memory_space<vmem>>, vector<2x16x32xbf16>
      %218 = arith.extf %217 : vector<2x16x32xbf16> to vector<2x16x32xf32>
      %c0_95 = arith.constant 0 : index
      %c8_96 = arith.constant 8 : index
      %c0_97 = arith.constant 0 : index
      %219 = vector.load %arg23[%c0_95, %c8_96, %c0_97] : memref<2x24x32xf32, #tpu.memory_space<vmem>>, vector<2x16x32xf32>
      tpu.vector_store %arg23[%c0_95, %c8_96, %c0_97], %218 {strides = array<i32>} : memref<2x24x32xf32, #tpu.memory_space<vmem>>, vector<2x16x32xf32>,
      %c0_98 = arith.constant 0 : index
      %c0_99 = arith.constant 0 : index
      %c0_100 = arith.constant 0 : index
      %220 = vector.load %arg3[%c0_98, %c0_99, %c0_100] : memref<1x8x32xf32, #tpu.memory_space<vmem>>, vector<1x8x32xf32>
      %221 = vector.shape_cast %220 : vector<1x8x32xf32> to vector<1x8x32xf32>
      %222 = vector.broadcast %221 : vector<1x8x32xf32> to vector<2x8x32xf32>
      %c0_101 = arith.constant 0 : index
      %c0_102 = arith.constant 0 : index
      %c0_103 = arith.constant 0 : index
      %223 = vector.load %arg23[%c0_101, %c0_102, %c0_103] : memref<2x24x32xf32, #tpu.memory_space<vmem>>, vector<2x8x32xf32>
      tpu.vector_store %arg23[%c0_101, %c0_102, %c0_103], %222 {strides = array<i32>} : memref<2x24x32xf32, #tpu.memory_space<vmem>>, vector<2x8x32xf32>,
    } else {
    }
    %c0 = arith.constant 0 : index
    %c0_1 = arith.constant 0 : index
    %c0_2 = arith.constant 0 : index
    %3 = vector.load %arg23[%c0, %c0_1, %c0_2] : memref<2x24x32xf32, #tpu.memory_space<vmem>>, vector<2x24x32xf32>
    %c0_3 = arith.constant 0 : index
    %c0_4 = arith.constant 0 : index
    %c0_5 = arith.constant 0 : index
    %4 = vector.load %arg4[%c0_3, %c0_4, %c0_5] : memref<1x1x32xf32, #tpu.memory_space<vmem>>, vector<1x1x32xf32>
    %5 = vector.shape_cast %4 : vector<1x1x32xf32> to vector<1x32xf32>
    %c0_6 = arith.constant 0 : index
    %c0_7 = arith.constant 0 : index
    %c0_8 = arith.constant 0 : index
    %6 = vector.load %arg5[%c0_6, %c0_7, %c0_8] : memref<1x1x32xf32, #tpu.memory_space<vmem>>, vector<1x1x32xf32>
    %7 = vector.shape_cast %6 : vector<1x1x32xf32> to vector<1x32xf32>
    %cst = arith.constant dense<0.000000e+00> : vector<2x24xf32>
    %8 = vector.multi_reduction <add>, %3, %cst [2] : vector<2x24x32xf32> to vector<2x24xf32>
    %9 = vector.shape_cast %8 : vector<2x24xf32> to vector<2x24x1xf32>
    %cst_9 = arith.constant 3.200000e+01 : f32
    %10 = vector.broadcast %cst_9 : f32 to vector<2x24x1xf32>
    %11 = arith.divf %9, %10 : vector<2x24x1xf32>
    %12 = vector.broadcast %11 : vector<2x24x1xf32> to vector<2x24x32xf32>
    %13 = arith.subf %3, %12 : vector<2x24x32xf32>
    %14 = arith.mulf %13, %13 : vector<2x24x32xf32>
    %cst_10 = arith.constant dense<0.000000e+00> : vector<2x24xf32>
    %15 = vector.multi_reduction <add>, %14, %cst_10 [2] : vector<2x24x32xf32> to vector<2x24xf32>
    %16 = vector.shape_cast %15 : vector<2x24xf32> to vector<2x24x1xf32>
    %cst_11 = arith.constant 3.200000e+01 : f32
    %17 = vector.broadcast %cst_11 : f32 to vector<2x24x1xf32>
    %18 = arith.divf %16, %17 : vector<2x24x1xf32>
    %19 = vector.broadcast %11 : vector<2x24x1xf32> to vector<2x24x32xf32>
    %20 = arith.subf %3, %19 : vector<2x24x32xf32>
    %cst_12 = arith.constant 9.99999974E-6 : f32
    %21 = vector.broadcast %cst_12 : f32 to vector<2x24x1xf32>
    %22 = arith.addf %18, %21 : vector<2x24x1xf32>
    %23 = math.rsqrt %22 : vector<2x24x1xf32>
    %24 = vector.broadcast %23 : vector<2x24x1xf32> to vector<2x24x32xf32>
    %25 = arith.mulf %20, %24 : vector<2x24x32xf32>
    %26 = vector.shape_cast %5 : vector<1x32xf32> to vector<1x1x32xf32>
    %27 = vector.broadcast %26 : vector<1x1x32xf32> to vector<2x24x32xf32>
    %28 = arith.mulf %25, %27 : vector<2x24x32xf32>
    %29 = vector.shape_cast %7 : vector<1x32xf32> to vector<1x1x32xf32>
    %30 = vector.broadcast %29 : vector<1x1x32xf32> to vector<2x24x32xf32>
    %31 = arith.addf %28, %30 : vector<2x24x32xf32>
    %32 = vector.shape_cast %31 : vector<2x24x32xf32> to vector<48x32xf32>
    %33 = arith.truncf %32 : vector<48x32xf32> to vector<48x32xbf16>
    %c0_13 = arith.constant 0 : index
    %c0_14 = arith.constant 0 : index
    %c0_15 = arith.constant 0 : index
    %34 = vector.load %arg6[%c0_13, %c0_14, %c0_15] : memref<1x32x96xbf16, #tpu.memory_space<vmem>>, vector<1x32x96xbf16>
    %35 = vector.shape_cast %34 : vector<1x32x96xbf16> to vector<32x96xbf16>
    %cst_16 = arith.constant dense<0.000000e+00> : vector<48x96xf32>
    %36 = tpu.matmul %33, %35, %cst_16 {dimension_numbers = #tpu.dot_dimension_numbers<[1], [0], [0], [1], [0, 0, 1, 1], [], []>} : vector<48x32xbf16>, vector<32x96xbf16>, vector<48x96xf32> -> vector<48x96xf32>
    %c0_17 = arith.constant 0 : index
    %c0_18 = arith.constant 0 : index
    %c0_19 = arith.constant 0 : index
    %37 = vector.load %arg7[%c0_17, %c0_18, %c0_19] : memref<1x1x96xf32, #tpu.memory_space<vmem>>, vector<1x1x96xf32>
    %38 = vector.shape_cast %37 : vector<1x1x96xf32> to vector<1x96xf32>
    %39 = vector.broadcast %38 : vector<1x96xf32> to vector<48x96xf32>
    %40 = arith.addf %36, %39 : vector<48x96xf32>
    %41 = vector.extract_strided_slice %40 {offsets = [0, 0], sizes = [48, 8], strides = [1, 1]} : vector<48x96xf32> to vector<48x8xf32>
    %42 = vector.shape_cast %41 : vector<48x8xf32> to vector<2x24x8xf32>
    %43 = arith.truncf %42 : vector<2x24x8xf32> to vector<2x24x8xbf16>
    %44 = vector.extract_strided_slice %40 {offsets = [0, 32], sizes = [48, 8], strides = [1, 1]} : vector<48x96xf32> to vector<48x8xf32>
    %45 = vector.shape_cast %44 : vector<48x8xf32> to vector<2x24x8xf32>
    %46 = arith.truncf %45 : vector<2x24x8xf32> to vector<2x24x8xbf16>
    %47 = vector.extract_strided_slice %40 {offsets = [0, 64], sizes = [48, 8], strides = [1, 1]} : vector<48x96xf32> to vector<48x8xf32>
    %48 = vector.shape_cast %47 : vector<48x8xf32> to vector<2x24x8xf32>
    %49 = arith.truncf %48 : vector<2x24x8xf32> to vector<2x24x8xbf16>
    "tpu.trace_start"() <{level = 10 : i32, message = "bqd,bkd->bqk"}> : () -> ()
    %cst_20 = arith.constant dense<0.000000e+00> : vector<2x24x24xf32>
    %50 = tpu.matmul %43, %46, %cst_20 {dimension_numbers = #tpu.dot_dimension_numbers<[2], [2], [1], [1], [0, 0, 0, 1, 1, 1], [0], [0]>} : vector<2x24x8xbf16>, vector<2x24x8xbf16>, vector<2x24x24xf32> -> vector<2x24x24xf32>
    "tpu.trace_stop"() : () -> ()
    %cst_21 = arith.constant 0.353553385 : f32
    %51 = vector.broadcast %cst_21 : f32 to vector<2x24x24xf32>
    %52 = arith.mulf %50, %51 : vector<2x24x24xf32>
    %cst_22 = arith.constant dense<0xFF800000> : vector<2x24xf32>
    %53 = vector.multi_reduction <maximumf>, %52, %cst_22 [2] : vector<2x24x24xf32> to vector<2x24xf32>
    %54 = vector.shape_cast %53 : vector<2x24xf32> to vector<2x24x1xf32>
    %55 = vector.broadcast %54 : vector<2x24x1xf32> to vector<2x24x24xf32>
    %56 = arith.subf %52, %55 : vector<2x24x24xf32>
    %57 = math.exp %56 : vector<2x24x24xf32>
    %cst_23 = arith.constant dense<0.000000e+00> : vector<2x24xf32>
    %58 = vector.multi_reduction <add>, %57, %cst_23 [2] : vector<2x24x24xf32> to vector<2x24xf32>
    %59 = vector.shape_cast %58 : vector<2x24xf32> to vector<2x24x1xf32>
    %60 = tpu.reciprocal %59 {approx = true} : vector<2x24x1xf32> -> vector<2x24x1xf32>
    %61 = vector.broadcast %60 : vector<2x24x1xf32> to vector<2x24x24xf32>
    %62 = arith.mulf %57, %61 : vector<2x24x24xf32>
    %63 = arith.truncf %62 : vector<2x24x24xf32> to vector<2x24x24xbf16>
    "tpu.trace_start"() <{level = 10 : i32, message = "bqk,bkd->bqd"}> : () -> ()
    %cst_24 = arith.constant dense<0.000000e+00> : vector<2x24x8xf32>
    %64 = tpu.matmul %63, %49, %cst_24 {dimension_numbers = #tpu.dot_dimension_numbers<[2], [1], [1], [2], [0, 0, 0, 1, 1, 2], [0], [0]>} : vector<2x24x24xbf16>, vector<2x24x8xbf16>, vector<2x24x8xf32> -> vector<2x24x8xf32>
    "tpu.trace_stop"() : () -> ()
    %c0_25 = arith.constant 0 : index
    %c0_26 = arith.constant 0 : index
    %c0_27 = arith.constant 0 : index
    %65 = vector.load %arg24[%c0_25, %c0_26, %c0_27] : memref<2x24x32xf32, #tpu.memory_space<vmem>>, vector<2x24x8xf32>
    tpu.vector_store %arg24[%c0_25, %c0_26, %c0_27], %64 {strides = array<i32>} : memref<2x24x32xf32, #tpu.memory_space<vmem>>, vector<2x24x8xf32>,
    %66 = vector.extract_strided_slice %40 {offsets = [0, 8], sizes = [48, 8], strides = [1, 1]} : vector<48x96xf32> to vector<48x8xf32>
    %67 = vector.shape_cast %66 : vector<48x8xf32> to vector<2x24x8xf32>
    %68 = arith.truncf %67 : vector<2x24x8xf32> to vector<2x24x8xbf16>
    %69 = vector.extract_strided_slice %40 {offsets = [0, 40], sizes = [48, 8], strides = [1, 1]} : vector<48x96xf32> to vector<48x8xf32>
    %70 = vector.shape_cast %69 : vector<48x8xf32> to vector<2x24x8xf32>
    %71 = arith.truncf %70 : vector<2x24x8xf32> to vector<2x24x8xbf16>
    %72 = vector.extract_strided_slice %40 {offsets = [0, 72], sizes = [48, 8], strides = [1, 1]} : vector<48x96xf32> to vector<48x8xf32>
    %73 = vector.shape_cast %72 : vector<48x8xf32> to vector<2x24x8xf32>
    %74 = arith.truncf %73 : vector<2x24x8xf32> to vector<2x24x8xbf16>
    "tpu.trace_start"() <{level = 10 : i32, message = "bqd,bkd->bqk"}> : () -> ()
    %cst_28 = arith.constant dense<0.000000e+00> : vector<2x24x24xf32>
    %75 = tpu.matmul %68, %71, %cst_28 {dimension_numbers = #tpu.dot_dimension_numbers<[2], [2], [1], [1], [0, 0, 0, 1, 1, 1], [0], [0]>} : vector<2x24x8xbf16>, vector<2x24x8xbf16>, vector<2x24x24xf32> -> vector<2x24x24xf32>
    "tpu.trace_stop"() : () -> ()
    %cst_29 = arith.constant 0.353553385 : f32
    %76 = vector.broadcast %cst_29 : f32 to vector<2x24x24xf32>
    %77 = arith.mulf %75, %76 : vector<2x24x24xf32>
    %cst_30 = arith.constant dense<0xFF800000> : vector<2x24xf32>
    %78 = vector.multi_reduction <maximumf>, %77, %cst_30 [2] : vector<2x24x24xf32> to vector<2x24xf32>
    %79 = vector.shape_cast %78 : vector<2x24xf32> to vector<2x24x1xf32>
    %80 = vector.broadcast %79 : vector<2x24x1xf32> to vector<2x24x24xf32>
    %81 = arith.subf %77, %80 : vector<2x24x24xf32>
    %82 = math.exp %81 : vector<2x24x24xf32>
    %cst_31 = arith.constant dense<0.000000e+00> : vector<2x24xf32>
    %83 = vector.multi_reduction <add>, %82, %cst_31 [2] : vector<2x24x24xf32> to vector<2x24xf32>
    %84 = vector.shape_cast %83 : vector<2x24xf32> to vector<2x24x1xf32>
    %85 = tpu.reciprocal %84 {approx = true} : vector<2x24x1xf32> -> vector<2x24x1xf32>
    %86 = vector.broadcast %85 : vector<2x24x1xf32> to vector<2x24x24xf32>
    %87 = arith.mulf %82, %86 : vector<2x24x24xf32>
    %88 = arith.truncf %87 : vector<2x24x24xf32> to vector<2x24x24xbf16>
    "tpu.trace_start"() <{level = 10 : i32, message = "bqk,bkd->bqd"}> : () -> ()
    %cst_32 = arith.constant dense<0.000000e+00> : vector<2x24x8xf32>
    %89 = tpu.matmul %88, %74, %cst_32 {dimension_numbers = #tpu.dot_dimension_numbers<[2], [1], [1], [2], [0, 0, 0, 1, 1, 2], [0], [0]>} : vector<2x24x24xbf16>, vector<2x24x8xbf16>, vector<2x24x8xf32> -> vector<2x24x8xf32>
    "tpu.trace_stop"() : () -> ()
    %c0_33 = arith.constant 0 : index
    %c0_34 = arith.constant 0 : index
    %c8 = arith.constant 8 : index
    %90 = vector.load %arg24[%c0_33, %c0_34, %c8] : memref<2x24x32xf32, #tpu.memory_space<vmem>>, vector<2x24x8xf32>
    tpu.vector_store %arg24[%c0_33, %c0_34, %c8], %89 {strides = array<i32>} : memref<2x24x32xf32, #tpu.memory_space<vmem>>, vector<2x24x8xf32>,
    %91 = vector.extract_strided_slice %40 {offsets = [0, 16], sizes = [48, 8], strides = [1, 1]} : vector<48x96xf32> to vector<48x8xf32>
    %92 = vector.shape_cast %91 : vector<48x8xf32> to vector<2x24x8xf32>
    %93 = arith.truncf %92 : vector<2x24x8xf32> to vector<2x24x8xbf16>
    %94 = vector.extract_strided_slice %40 {offsets = [0, 48], sizes = [48, 8], strides = [1, 1]} : vector<48x96xf32> to vector<48x8xf32>
    %95 = vector.shape_cast %94 : vector<48x8xf32> to vector<2x24x8xf32>
    %96 = arith.truncf %95 : vector<2x24x8xf32> to vector<2x24x8xbf16>
    %97 = vector.extract_strided_slice %40 {offsets = [0, 80], sizes = [48, 8], strides = [1, 1]} : vector<48x96xf32> to vector<48x8xf32>
    %98 = vector.shape_cast %97 : vector<48x8xf32> to vector<2x24x8xf32>
    %99 = arith.truncf %98 : vector<2x24x8xf32> to vector<2x24x8xbf16>
    "tpu.trace_start"() <{level = 10 : i32, message = "bqd,bkd->bqk"}> : () -> ()
    %cst_35 = arith.constant dense<0.000000e+00> : vector<2x24x24xf32>
    %100 = tpu.matmul %93, %96, %cst_35 {dimension_numbers = #tpu.dot_dimension_numbers<[2], [2], [1], [1], [0, 0, 0, 1, 1, 1], [0], [0]>} : vector<2x24x8xbf16>, vector<2x24x8xbf16>, vector<2x24x24xf32> -> vector<2x24x24xf32>
    "tpu.trace_stop"() : () -> ()
    %cst_36 = arith.constant 0.353553385 : f32
    %101 = vector.broadcast %cst_36 : f32 to vector<2x24x24xf32>
    %102 = arith.mulf %100, %101 : vector<2x24x24xf32>
    %cst_37 = arith.constant dense<0xFF800000> : vector<2x24xf32>
    %103 = vector.multi_reduction <maximumf>, %102, %cst_37 [2] : vector<2x24x24xf32> to vector<2x24xf32>
    %104 = vector.shape_cast %103 : vector<2x24xf32> to vector<2x24x1xf32>
    %105 = vector.broadcast %104 : vector<2x24x1xf32> to vector<2x24x24xf32>
    %106 = arith.subf %102, %105 : vector<2x24x24xf32>
    %107 = math.exp %106 : vector<2x24x24xf32>
    %cst_38 = arith.constant dense<0.000000e+00> : vector<2x24xf32>
    %108 = vector.multi_reduction <add>, %107, %cst_38 [2] : vector<2x24x24xf32> to vector<2x24xf32>
    %109 = vector.shape_cast %108 : vector<2x24xf32> to vector<2x24x1xf32>
    %110 = tpu.reciprocal %109 {approx = true} : vector<2x24x1xf32> -> vector<2x24x1xf32>
    %111 = vector.broadcast %110 : vector<2x24x1xf32> to vector<2x24x24xf32>
    %112 = arith.mulf %107, %111 : vector<2x24x24xf32>
    %113 = arith.truncf %112 : vector<2x24x24xf32> to vector<2x24x24xbf16>
    "tpu.trace_start"() <{level = 10 : i32, message = "bqk,bkd->bqd"}> : () -> ()
    %cst_39 = arith.constant dense<0.000000e+00> : vector<2x24x8xf32>
    %114 = tpu.matmul %113, %99, %cst_39 {dimension_numbers = #tpu.dot_dimension_numbers<[2], [1], [1], [2], [0, 0, 0, 1, 1, 2], [0], [0]>} : vector<2x24x24xbf16>, vector<2x24x8xbf16>, vector<2x24x8xf32> -> vector<2x24x8xf32>
    "tpu.trace_stop"() : () -> ()
    %c0_40 = arith.constant 0 : index
    %c0_41 = arith.constant 0 : index
    %c16 = arith.constant 16 : index
    %115 = vector.load %arg24[%c0_40, %c0_41, %c16] : memref<2x24x32xf32, #tpu.memory_space<vmem>>, vector<2x24x8xf32>
    tpu.vector_store %arg24[%c0_40, %c0_41, %c16], %114 {strides = array<i32>} : memref<2x24x32xf32, #tpu.memory_space<vmem>>, vector<2x24x8xf32>,
    %116 = vector.extract_strided_slice %40 {offsets = [0, 24], sizes = [48, 8], strides = [1, 1]} : vector<48x96xf32> to vector<48x8xf32>
    %117 = vector.shape_cast %116 : vector<48x8xf32> to vector<2x24x8xf32>
    %118 = arith.truncf %117 : vector<2x24x8xf32> to vector<2x24x8xbf16>
    %119 = vector.extract_strided_slice %40 {offsets = [0, 56], sizes = [48, 8], strides = [1, 1]} : vector<48x96xf32> to vector<48x8xf32>
    %120 = vector.shape_cast %119 : vector<48x8xf32> to vector<2x24x8xf32>
    %121 = arith.truncf %120 : vector<2x24x8xf32> to vector<2x24x8xbf16>
    %122 = vector.extract_strided_slice %40 {offsets = [0, 88], sizes = [48, 8], strides = [1, 1]} : vector<48x96xf32> to vector<48x8xf32>
    %123 = vector.shape_cast %122 : vector<48x8xf32> to vector<2x24x8xf32>
    %124 = arith.truncf %123 : vector<2x24x8xf32> to vector<2x24x8xbf16>
    "tpu.trace_start"() <{level = 10 : i32, message = "bqd,bkd->bqk"}> : () -> ()
    %cst_42 = arith.constant dense<0.000000e+00> : vector<2x24x24xf32>
    %125 = tpu.matmul %118, %121, %cst_42 {dimension_numbers = #tpu.dot_dimension_numbers<[2], [2], [1], [1], [0, 0, 0, 1, 1, 1], [0], [0]>} : vector<2x24x8xbf16>, vector<2x24x8xbf16>, vector<2x24x24xf32> -> vector<2x24x24xf32>
    "tpu.trace_stop"() : () -> ()
    %cst_43 = arith.constant 0.353553385 : f32
    %126 = vector.broadcast %cst_43 : f32 to vector<2x24x24xf32>
    %127 = arith.mulf %125, %126 : vector<2x24x24xf32>
    %cst_44 = arith.constant dense<0xFF800000> : vector<2x24xf32>
    %128 = vector.multi_reduction <maximumf>, %127, %cst_44 [2] : vector<2x24x24xf32> to vector<2x24xf32>
    %129 = vector.shape_cast %128 : vector<2x24xf32> to vector<2x24x1xf32>
    %130 = vector.broadcast %129 : vector<2x24x1xf32> to vector<2x24x24xf32>
    %131 = arith.subf %127, %130 : vector<2x24x24xf32>
    %132 = math.exp %131 : vector<2x24x24xf32>
    %cst_45 = arith.constant dense<0.000000e+00> : vector<2x24xf32>
    %133 = vector.multi_reduction <add>, %132, %cst_45 [2] : vector<2x24x24xf32> to vector<2x24xf32>
    %134 = vector.shape_cast %133 : vector<2x24xf32> to vector<2x24x1xf32>
    %135 = tpu.reciprocal %134 {approx = true} : vector<2x24x1xf32> -> vector<2x24x1xf32>
    %136 = vector.broadcast %135 : vector<2x24x1xf32> to vector<2x24x24xf32>
    %137 = arith.mulf %132, %136 : vector<2x24x24xf32>
    %138 = arith.truncf %137 : vector<2x24x24xf32> to vector<2x24x24xbf16>
    "tpu.trace_start"() <{level = 10 : i32, message = "bqk,bkd->bqd"}> : () -> ()
    %cst_46 = arith.constant dense<0.000000e+00> : vector<2x24x8xf32>
    %139 = tpu.matmul %138, %124, %cst_46 {dimension_numbers = #tpu.dot_dimension_numbers<[2], [1], [1], [2], [0, 0, 0, 1, 1, 2], [0], [0]>} : vector<2x24x24xbf16>, vector<2x24x8xbf16>, vector<2x24x8xf32> -> vector<2x24x8xf32>
    "tpu.trace_stop"() : () -> ()
    %c0_47 = arith.constant 0 : index
    %c0_48 = arith.constant 0 : index
    %c24 = arith.constant 24 : index
    %140 = vector.load %arg24[%c0_47, %c0_48, %c24] : memref<2x24x32xf32, #tpu.memory_space<vmem>>, vector<2x24x8xf32>
    tpu.vector_store %arg24[%c0_47, %c0_48, %c24], %139 {strides = array<i32>} : memref<2x24x32xf32, #tpu.memory_space<vmem>>, vector<2x24x8xf32>,
    %c0_49 = arith.constant 0 : index
    %c0_50 = arith.constant 0 : index
    %c0_51 = arith.constant 0 : index
    %141 = vector.load %arg24[%c0_49, %c0_50, %c0_51] : memref<2x24x32xf32, #tpu.memory_space<vmem>>, vector<2x24x32xf32>
    %142 = vector.shape_cast %141 : vector<2x24x32xf32> to vector<48x32xf32>
    %143 = arith.truncf %142 : vector<48x32xf32> to vector<48x32xbf16>
    %c0_52 = arith.constant 0 : index
    %c0_53 = arith.constant 0 : index
    %c0_54 = arith.constant 0 : index
    %144 = vector.load %arg8[%c0_52, %c0_53, %c0_54] : memref<1x32x32xbf16, #tpu.memory_space<vmem>>, vector<1x32x32xbf16>
    %145 = vector.shape_cast %144 : vector<1x32x32xbf16> to vector<32x32xbf16>
    %cst_55 = arith.constant dense<0.000000e+00> : vector<48x32xf32>
    %146 = tpu.matmul %143, %145, %cst_55 {dimension_numbers = #tpu.dot_dimension_numbers<[1], [0], [0], [1], [0, 0, 1, 1], [], []>} : vector<48x32xbf16>, vector<32x32xbf16>, vector<48x32xf32> -> vector<48x32xf32>
    %c0_56 = arith.constant 0 : index
    %c0_57 = arith.constant 0 : index
    %c0_58 = arith.constant 0 : index
    %147 = vector.load %arg9[%c0_56, %c0_57, %c0_58] : memref<1x1x32xf32, #tpu.memory_space<vmem>>, vector<1x1x32xf32>
    %148 = vector.shape_cast %147 : vector<1x1x32xf32> to vector<1x32xf32>
    %149 = vector.broadcast %148 : vector<1x32xf32> to vector<48x32xf32>
    %150 = arith.addf %146, %149 : vector<48x32xf32>
    %151 = vector.shape_cast %150 : vector<48x32xf32> to vector<2x24x32xf32>
    %152 = arith.addf %3, %151 : vector<2x24x32xf32>
    %c0_59 = arith.constant 0 : index
    %c0_60 = arith.constant 0 : index
    %c0_61 = arith.constant 0 : index
    %153 = vector.load %arg10[%c0_59, %c0_60, %c0_61] : memref<1x1x32xf32, #tpu.memory_space<vmem>>, vector<1x1x32xf32>
    %154 = vector.shape_cast %153 : vector<1x1x32xf32> to vector<1x32xf32>
    %c0_62 = arith.constant 0 : index
    %c0_63 = arith.constant 0 : index
    %c0_64 = arith.constant 0 : index
    %155 = vector.load %arg11[%c0_62, %c0_63, %c0_64] : memref<1x1x32xf32, #tpu.memory_space<vmem>>, vector<1x1x32xf32>
    %156 = vector.shape_cast %155 : vector<1x1x32xf32> to vector<1x32xf32>
    %cst_65 = arith.constant dense<0.000000e+00> : vector<2x24xf32>
    %157 = vector.multi_reduction <add>, %152, %cst_65 [2] : vector<2x24x32xf32> to vector<2x24xf32>
    %158 = vector.shape_cast %157 : vector<2x24xf32> to vector<2x24x1xf32>
    %cst_66 = arith.constant 3.200000e+01 : f32
    %159 = vector.broadcast %cst_66 : f32 to vector<2x24x1xf32>
    %160 = arith.divf %158, %159 : vector<2x24x1xf32>
    %161 = vector.broadcast %160 : vector<2x24x1xf32> to vector<2x24x32xf32>
    %162 = arith.subf %152, %161 : vector<2x24x32xf32>
    %163 = arith.mulf %162, %162 : vector<2x24x32xf32>
    %cst_67 = arith.constant dense<0.000000e+00> : vector<2x24xf32>
    %164 = vector.multi_reduction <add>, %163, %cst_67 [2] : vector<2x24x32xf32> to vector<2x24xf32>
    %165 = vector.shape_cast %164 : vector<2x24xf32> to vector<2x24x1xf32>
    %cst_68 = arith.constant 3.200000e+01 : f32
    %166 = vector.broadcast %cst_68 : f32 to vector<2x24x1xf32>
    %167 = arith.divf %165, %166 : vector<2x24x1xf32>
    %168 = vector.broadcast %160 : vector<2x24x1xf32> to vector<2x24x32xf32>
    %169 = arith.subf %152, %168 : vector<2x24x32xf32>
    %cst_69 = arith.constant 9.99999974E-6 : f32
    %170 = vector.broadcast %cst_69 : f32 to vector<2x24x1xf32>
    %171 = arith.addf %167, %170 : vector<2x24x1xf32>
    %172 = math.rsqrt %171 : vector<2x24x1xf32>
    %173 = vector.broadcast %172 : vector<2x24x1xf32> to vector<2x24x32xf32>
    %174 = arith.mulf %169, %173 : vector<2x24x32xf32>
    %175 = vector.shape_cast %154 : vector<1x32xf32> to vector<1x1x32xf32>
    %176 = vector.broadcast %175 : vector<1x1x32xf32> to vector<2x24x32xf32>
    %177 = arith.mulf %174, %176 : vector<2x24x32xf32>
    %178 = vector.shape_cast %156 : vector<1x32xf32> to vector<1x1x32xf32>
    %179 = vector.broadcast %178 : vector<1x1x32xf32> to vector<2x24x32xf32>
    %180 = arith.addf %177, %179 : vector<2x24x32xf32>
    %181 = vector.shape_cast %180 : vector<2x24x32xf32> to vector<48x32xf32>
    %182 = arith.truncf %181 : vector<48x32xf32> to vector<48x32xbf16>
    %c0_70 = arith.constant 0 : index
    %c0_71 = arith.constant 0 : index
    %c0_72 = arith.constant 0 : index
    %183 = vector.load %arg12[%c0_70, %c0_71, %c0_72] : memref<1x32x64xbf16, #tpu.memory_space<vmem>>, vector<1x32x64xbf16>
    %184 = vector.shape_cast %183 : vector<1x32x64xbf16> to vector<32x64xbf16>
    %cst_73 = arith.constant dense<0.000000e+00> : vector<48x64xf32>
    %185 = tpu.matmul %182, %184, %cst_73 {dimension_numbers = #tpu.dot_dimension_numbers<[1], [0], [0], [1], [0, 0, 1, 1], [], []>} : vector<48x32xbf16>, vector<32x64xbf16>, vector<48x64xf32> -> vector<48x64xf32>
    %c0_74 = arith.constant 0 : index
    %c0_75 = arith.constant 0 : index
    %c0_76 = arith.constant 0 : index
    %186 = vector.load %arg13[%c0_74, %c0_75, %c0_76] : memref<1x1x64xf32, #tpu.memory_space<vmem>>, vector<1x1x64xf32>
    %187 = vector.shape_cast %186 : vector<1x1x64xf32> to vector<1x64xf32>
    %188 = vector.broadcast %187 : vector<1x64xf32> to vector<48x64xf32>
    %189 = arith.addf %185, %188 : vector<48x64xf32>
    %190 = arith.mulf %189, %189 : vector<48x64xf32>
    %191 = arith.mulf %189, %190 : vector<48x64xf32>
    %cst_77 = arith.constant 4.471500e-02 : f32
    %192 = vector.broadcast %cst_77 : f32 to vector<48x64xf32>
    %193 = arith.mulf %192, %191 : vector<48x64xf32>
    %194 = arith.addf %189, %193 : vector<48x64xf32>
    %cst_78 = arith.constant 0.797884583 : f32
    %195 = vector.broadcast %cst_78 : f32 to vector<48x64xf32>
    %196 = arith.mulf %195, %194 : vector<48x64xf32>
    %197 = math.tanh %196 : vector<48x64xf32>
    %cst_79 = arith.constant 1.000000e+00 : f32
    %198 = vector.broadcast %cst_79 : f32 to vector<48x64xf32>
    %199 = arith.addf %198, %197 : vector<48x64xf32>
    %cst_80 = arith.constant 5.000000e-01 : f32
    %200 = vector.broadcast %cst_80 : f32 to vector<48x64xf32>
    %201 = arith.mulf %200, %199 : vector<48x64xf32>
    %202 = arith.mulf %189, %201 : vector<48x64xf32>
    %203 = arith.truncf %202 : vector<48x64xf32> to vector<48x64xbf16>
    %c0_81 = arith.constant 0 : index
    %c0_82 = arith.constant 0 : index
    %c0_83 = arith.constant 0 : index
    %204 = vector.load %arg14[%c0_81, %c0_82, %c0_83] : memref<1x64x32xbf16, #tpu.memory_space<vmem>>, vector<1x64x32xbf16>
    %205 = vector.shape_cast %204 : vector<1x64x32xbf16> to vector<64x32xbf16>
    %cst_84 = arith.constant dense<0.000000e+00> : vector<48x32xf32>
    %206 = tpu.matmul %203, %205, %cst_84 {dimension_numbers = #tpu.dot_dimension_numbers<[1], [0], [0], [1], [0, 0, 1, 1], [], []>} : vector<48x64xbf16>, vector<64x32xbf16>, vector<48x32xf32> -> vector<48x32xf32>
    %c0_85 = arith.constant 0 : index
    %c0_86 = arith.constant 0 : index
    %c0_87 = arith.constant 0 : index
    %207 = vector.load %arg15[%c0_85, %c0_86, %c0_87] : memref<1x1x32xf32, #tpu.memory_space<vmem>>, vector<1x1x32xf32>
    %208 = vector.shape_cast %207 : vector<1x1x32xf32> to vector<1x32xf32>
    %209 = vector.broadcast %208 : vector<1x32xf32> to vector<48x32xf32>
    %210 = arith.addf %206, %209 : vector<48x32xf32>
    %211 = vector.shape_cast %210 : vector<48x32xf32> to vector<2x24x32xf32>
    %212 = arith.addf %152, %211 : vector<2x24x32xf32>
    %c0_88 = arith.constant 0 : index
    %c0_89 = arith.constant 0 : index
    %c0_90 = arith.constant 0 : index
    %213 = vector.load %arg23[%c0_88, %c0_89, %c0_90] : memref<2x24x32xf32, #tpu.memory_space<vmem>>, vector<2x24x32xf32>
    tpu.vector_store %arg23[%c0_88, %c0_89, %c0_90], %212 {strides = array<i32>} : memref<2x24x32xf32, #tpu.memory_space<vmem>>, vector<2x24x32xf32>,
    %c1_i32 = arith.constant 1 : i32
    %214 = arith.cmpi eq, %arg1, %c1_i32 : i32
    %215 = arith.extui %214 : i1 to i32
    %c0_i32_91 = arith.constant 0 : i32
    %216 = arith.cmpi ne, %215, %c0_i32_91 : i32
    scf.if %216 {
      %217 = vector.extract_strided_slice %212 {offsets = [0, 0, 0], sizes = [2, 8, 32], strides = [1, 1, 1]} : vector<2x24x32xf32> to vector<2x8x32xf32>
      %218 = vector.extract_strided_slice %212 {offsets = [0, 8, 0], sizes = [2, 16, 32], strides = [1, 1, 1]} : vector<2x24x32xf32> to vector<2x16x32xf32>
      %219 = arith.truncf %217 : vector<2x8x32xf32> to vector<2x8x32xbf16>
      %c0_92 = arith.constant 0 : index
      %c0_93 = arith.constant 0 : index
      %c0_94 = arith.constant 0 : index
      %220 = vector.load %arg21[%c0_92, %c0_93, %c0_94] : memref<2x8x32xbf16, #tpu.memory_space<vmem>>, vector<2x8x32xbf16>
      tpu.vector_store %arg21[%c0_92, %c0_93, %c0_94], %219 {strides = array<i32>} : memref<2x8x32xbf16, #tpu.memory_space<vmem>>, vector<2x8x32xbf16>,
      %221 = arith.truncf %218 : vector<2x16x32xf32> to vector<2x16x32xbf16>
      %c0_95 = arith.constant 0 : index
      %c0_96 = arith.constant 0 : index
      %c0_97 = arith.constant 0 : index
      %222 = vector.load %arg22[%c0_95, %c0_96, %c0_97] : memref<2x16x32xbf16, #tpu.memory_space<vmem>>, vector<2x16x32xbf16>
      tpu.vector_store %arg22[%c0_95, %c0_96, %c0_97], %221 {strides = array<i32>} : memref<2x16x32xbf16, #tpu.memory_space<vmem>>, vector<2x16x32xbf16>,
      %223 = vector.shape_cast %217 : vector<2x8x32xf32> to vector<16x32xf32>
      %c0_98 = arith.constant 0 : index
      %c0_99 = arith.constant 0 : index
      %224 = vector.load %arg16[%c0_98, %c0_99] : memref<1x32xf32, #tpu.memory_space<vmem>>, vector<1x32xf32>
      %c0_100 = arith.constant 0 : index
      %c0_101 = arith.constant 0 : index
      %225 = vector.load %arg17[%c0_100, %c0_101] : memref<1x32xf32, #tpu.memory_space<vmem>>, vector<1x32xf32>
      %cst_102 = arith.constant dense<0.000000e+00> : vector<16xf32>
      %226 = vector.multi_reduction <add>, %223, %cst_102 [1] : vector<16x32xf32> to vector<16xf32>
      %227 = vector.shape_cast %226 : vector<16xf32> to vector<16x1xf32>
      %cst_103 = arith.constant 3.200000e+01 : f32
      %228 = vector.broadcast %cst_103 : f32 to vector<16x1xf32>
      %229 = arith.divf %227, %228 : vector<16x1xf32>
      %230 = vector.broadcast %229 : vector<16x1xf32> to vector<16x32xf32>
      %231 = arith.subf %223, %230 : vector<16x32xf32>
      %232 = arith.mulf %231, %231 : vector<16x32xf32>
      %cst_104 = arith.constant dense<0.000000e+00> : vector<16xf32>
      %233 = vector.multi_reduction <add>, %232, %cst_104 [1] : vector<16x32xf32> to vector<16xf32>
      %234 = vector.shape_cast %233 : vector<16xf32> to vector<16x1xf32>
      %cst_105 = arith.constant 3.200000e+01 : f32
      %235 = vector.broadcast %cst_105 : f32 to vector<16x1xf32>
      %236 = arith.divf %234, %235 : vector<16x1xf32>
      %237 = vector.broadcast %229 : vector<16x1xf32> to vector<16x32xf32>
      %238 = arith.subf %223, %237 : vector<16x32xf32>
      %cst_106 = arith.constant 9.99999974E-6 : f32
      %239 = vector.broadcast %cst_106 : f32 to vector<16x1xf32>
      %240 = arith.addf %236, %239 : vector<16x1xf32>
      %241 = math.rsqrt %240 : vector<16x1xf32>
      %242 = vector.broadcast %241 : vector<16x1xf32> to vector<16x32xf32>
      %243 = arith.mulf %238, %242 : vector<16x32xf32>
      %244 = vector.broadcast %224 : vector<1x32xf32> to vector<16x32xf32>
      %245 = arith.mulf %243, %244 : vector<16x32xf32>
      %246 = vector.broadcast %225 : vector<1x32xf32> to vector<16x32xf32>
      %247 = arith.addf %245, %246 : vector<16x32xf32>
      %248 = arith.truncf %247 : vector<16x32xf32> to vector<16x32xbf16>
      %c0_107 = arith.constant 0 : index
      %c0_108 = arith.constant 0 : index
      %249 = vector.load %arg18[%c0_107, %c0_108] : memref<32x4xbf16, #tpu.memory_space<vmem>>, vector<32x4xbf16>
      %cst_109 = arith.constant dense<0.000000e+00> : vector<16x4xf32>
      %250 = tpu.matmul %248, %249, %cst_109 {dimension_numbers = #tpu.dot_dimension_numbers<[1], [0], [0], [1], [0, 0, 1, 1], [], []>} : vector<16x32xbf16>, vector<32x4xbf16>, vector<16x4xf32> -> vector<16x4xf32>
      %c0_110 = arith.constant 0 : index
      %c0_111 = arith.constant 0 : index
      %251 = vector.load %arg19[%c0_110, %c0_111] : memref<1x4xf32, #tpu.memory_space<vmem>>, vector<1x4xf32>
      %252 = vector.broadcast %251 : vector<1x4xf32> to vector<16x4xf32>
      %253 = arith.addf %250, %252 : vector<16x4xf32>
      %254 = vector.shape_cast %253 : vector<16x4xf32> to vector<2x8x4xf32>
      %c0_112 = arith.constant 0 : index
      %c0_113 = arith.constant 0 : index
      %c0_114 = arith.constant 0 : index
      %255 = vector.load %arg20[%c0_112, %c0_113, %c0_114] : memref<2x8x4xf32, #tpu.memory_space<vmem>>, vector<2x8x4xf32>
      tpu.vector_store %arg20[%c0_112, %c0_113, %c0_114], %254 {strides = array<i32>} : memref<2x8x4xf32, #tpu.memory_space<vmem>>, vector<2x8x4xf32>,
    } else {
    }
    return
  }
  func.func @transform_0(%arg0: i32, %arg1: i32) -> (i32, i32, i32) {
    %c0_i32 = arith.constant 0 : i32
    %c0_i32_0 = arith.constant 0 : i32
    %c0_i32_1 = arith.constant 0 : i32
    return %arg0, %c0_i32, %c0_i32_0 : i32, i32, i32
  }
  func.func @transform_1(%arg0: i32, %arg1: i32) -> (i32, i32, i32) {
    %c0_i32 = arith.constant 0 : i32
    %c0_i32_0 = arith.constant 0 : i32
    %c0_i32_1 = arith.constant 0 : i32
    %c0_i32_2 = arith.constant 0 : i32
    return %c0_i32, %c0_i32_0, %c0_i32_1 : i32, i32, i32
  }
  func.func @transform_2(%arg0: i32, %arg1: i32) -> (i32, i32, i32) {
    %c0_i32 = arith.constant 0 : i32
    %c0_i32_0 = arith.constant 0 : i32
    %c0_i32_1 = arith.constant 0 : i32
    return %arg1, %c0_i32, %c0_i32_0 : i32, i32, i32
  }
  func.func @transform_3(%arg0: i32, %arg1: i32) -> (i32, i32, i32) {
    %c0_i32 = arith.constant 0 : i32
    %c0_i32_0 = arith.constant 0 : i32
    %c0_i32_1 = arith.constant 0 : i32
    return %arg1, %c0_i32, %c0_i32_0 : i32, i32, i32
  }
  func.func @transform_4(%arg0: i32, %arg1: i32) -> (i32, i32, i32) {
    %c0_i32 = arith.constant 0 : i32
    %c0_i32_0 = arith.constant 0 : i32
    %c0_i32_1 = arith.constant 0 : i32
    return %arg1, %c0_i32, %c0_i32_0 : i32, i32, i32
  }
  func.func @transform_5(%arg0: i32, %arg1: i32) -> (i32, i32, i32) {
    %c0_i32 = arith.constant 0 : i32
    %c0_i32_0 = arith.constant 0 : i32
    %c0_i32_1 = arith.constant 0 : i32
    return %arg1, %c0_i32, %c0_i32_0 : i32, i32, i32
  }
  func.func @transform_6(%arg0: i32, %arg1: i32) -> (i32, i32, i32) {
    %c0_i32 = arith.constant 0 : i32
    %c0_i32_0 = arith.constant 0 : i32
    %c0_i32_1 = arith.constant 0 : i32
    return %arg1, %c0_i32, %c0_i32_0 : i32, i32, i32
  }
  func.func @transform_7(%arg0: i32, %arg1: i32) -> (i32, i32, i32) {
    %c0_i32 = arith.constant 0 : i32
    %c0_i32_0 = arith.constant 0 : i32
    %c0_i32_1 = arith.constant 0 : i32
    return %arg1, %c0_i32, %c0_i32_0 : i32, i32, i32
  }
  func.func @transform_8(%arg0: i32, %arg1: i32) -> (i32, i32, i32) {
    %c0_i32 = arith.constant 0 : i32
    %c0_i32_0 = arith.constant 0 : i32
    %c0_i32_1 = arith.constant 0 : i32
    return %arg1, %c0_i32, %c0_i32_0 : i32, i32, i32
  }
  func.func @transform_9(%arg0: i32, %arg1: i32) -> (i32, i32, i32) {
    %c0_i32 = arith.constant 0 : i32
    %c0_i32_0 = arith.constant 0 : i32
    %c0_i32_1 = arith.constant 0 : i32
    return %arg1, %c0_i32, %c0_i32_0 : i32, i32, i32
  }
  func.func @transform_10(%arg0: i32, %arg1: i32) -> (i32, i32, i32) {
    %c0_i32 = arith.constant 0 : i32
    %c0_i32_0 = arith.constant 0 : i32
    %c0_i32_1 = arith.constant 0 : i32
    return %arg1, %c0_i32, %c0_i32_0 : i32, i32, i32
  }
  func.func @transform_11(%arg0: i32, %arg1: i32) -> (i32, i32, i32) {
    %c0_i32 = arith.constant 0 : i32
    %c0_i32_0 = arith.constant 0 : i32
    %c0_i32_1 = arith.constant 0 : i32
    return %arg1, %c0_i32, %c0_i32_0 : i32, i32, i32
  }
  func.func @transform_12(%arg0: i32, %arg1: i32) -> (i32, i32, i32) {
    %c0_i32 = arith.constant 0 : i32
    %c0_i32_0 = arith.constant 0 : i32
    %c0_i32_1 = arith.constant 0 : i32
    return %arg1, %c0_i32, %c0_i32_0 : i32, i32, i32
  }
  func.func @transform_13(%arg0: i32, %arg1: i32) -> (i32, i32, i32) {
    %c0_i32 = arith.constant 0 : i32
    %c0_i32_0 = arith.constant 0 : i32
    %c0_i32_1 = arith.constant 0 : i32
    return %arg1, %c0_i32, %c0_i32_0 : i32, i32, i32
  }
  func.func @transform_14(%arg0: i32, %arg1: i32) -> (i32, i32) {
    %c0_i32 = arith.constant 0 : i32
    %c0_i32_0 = arith.constant 0 : i32
    %c0_i32_1 = arith.constant 0 : i32
    return %c0_i32, %c0_i32_0 : i32, i32
  }
  func.func @transform_15(%arg0: i32, %arg1: i32) -> (i32, i32) {
    %c0_i32 = arith.constant 0 : i32
    %c0_i32_0 = arith.constant 0 : i32
    %c0_i32_1 = arith.constant 0 : i32
    return %c0_i32, %c0_i32_0 : i32, i32
  }
  func.func @transform_16(%arg0: i32, %arg1: i32) -> (i32, i32) {
    %c0_i32 = arith.constant 0 : i32
    %c0_i32_0 = arith.constant 0 : i32
    %c0_i32_1 = arith.constant 0 : i32
    return %c0_i32, %c0_i32_0 : i32, i32
  }
  func.func @transform_17(%arg0: i32, %arg1: i32) -> (i32, i32) {
    %c0_i32 = arith.constant 0 : i32
    %c0_i32_0 = arith.constant 0 : i32
    %c0_i32_1 = arith.constant 0 : i32
    return %c0_i32, %c0_i32_0 : i32, i32
  }
  func.func @transform_18(%arg0: i32, %arg1: i32) -> (i32, i32, i32) {
    %c0_i32 = arith.constant 0 : i32
    %c0_i32_0 = arith.constant 0 : i32
    %c0_i32_1 = arith.constant 0 : i32
    return %arg0, %c0_i32, %c0_i32_0 : i32, i32, i32
  }
  func.func @transform_19(%arg0: i32, %arg1: i32) -> (i32, i32, i32) {
    %c0_i32 = arith.constant 0 : i32
    %c0_i32_0 = arith.constant 0 : i32
    %c0_i32_1 = arith.constant 0 : i32
    return %arg0, %c0_i32, %c0_i32_0 : i32, i32, i32
  }
  func.func @transform_20(%arg0: i32, %arg1: i32) -> (i32, i32, i32) {
    %c0_i32 = arith.constant 0 : i32
    %c0_i32_0 = arith.constant 0 : i32
    %c0_i32_1 = arith.constant 0 : i32
    return %arg0, %c0_i32, %c0_i32_0 : i32, i32, i32
  }
}

</mosaic_0001>

<bundles_post_ra>
// kernel: _forward_impl.1
= control target key start
LH: loop header
LB: loop body
LE: loop exit
PB: predicated region body
PF: predicated region fallthrough
CT: control target
= control target key end

     0   :  { %s4924_s0 = inlined_call_operand.vmem [shape: bf16[2,16,32], index: 0, kind: input, shape index: {}]   ;;  %s4925_s1 = inlined_call_operand.vmem [shape: f32[1,8,32], index: 1, kind: input, shape index: {}]   ;;  %s4926_s2 = inlined_call_operand.vmem [shape: f32[2,1,32], index: 2, kind: input, shape index: {}, may-alias: {2,8}]   ;;  %s4927_s3 = inlined_call_operand.vmem [shape: f32[2,1,32], index: 3, kind: input, shape index: {}, may-alias: {3,7,9,13}]   ;;  %s4928_s4 = inlined_call_operand.vmem [shape: bf16[2,32,96], index: 4, kind: input, shape index: {}]   ;;  %s4929_s5 = inlined_call_operand.vmem [shape: f32[2,1,96], index: 5, kind: input, shape index: {}]   ;;  %s4930_s6 = inlined_call_operand.vmem [shape: bf16[2,32,32], index: 6, kind: input, shape index: {}]   ;;  %s4931_s7 = inlined_call_operand.vmem [shape: f32[2,1,32], index: 7, kind: input, shape index: {}, may-alias: {3,7,9,13}]   ;;  %s4932_s8 = inlined_call_operand.vmem [shape: f32[2,1,32], index: 8, kind: input, shape index: {}, may-alias: {2,8}]   ;;  %s4933_s9 = inlined_call_operand.vmem [shape: f32[2,1,32], index: 9, kind: input, shape index: {}, may-alias: {3,7,9,13}]   ;;  %s4934_s10 = inlined_call_operand.vmem [shape: bf16[2,32,64], index: 10, kind: input, shape index: {}]   ;;  %s4935_s11 = inlined_call_operand.vmem [shape: f32[2,1,64], index: 11, kind: input, shape index: {}]   ;;  %s4936_s12 = inlined_call_operand.vmem [shape: bf16[2,64,32], index: 12, kind: input, shape index: {}]   ;;  %s4937_s13 = inlined_call_operand.vmem [shape: f32[2,1,32], index: 13, kind: input, shape index: {}, may-alias: {3,7,9,13}]   ;;  %s4938_s14 = inlined_call_operand.vmem [shape: f32[1,32], index: 14, kind: input, shape index: {}]   ;;  %s4939_s15 = inlined_call_operand.vmem [shape: f32[1,32], index: 15, kind: input, shape index: {}]   ;;  %s4940_s16 = inlined_call_operand.vmem [shape: bf16[32,4], index: 16, kind: input, shape index: {}]   ;;  %s4941_s17 = inlined_call_operand.vmem [shape: f32[1,4], index: 17, kind: input, shape index: {}]   ;;  %s4942_s18 = inlined_call_operand.vmem [shape: f32[2,8,4], index: 18, kind: output, shape index: {0}]   ;;  %s4943_s19 = inlined_call_operand.hbm [shape: bf16[2,8,32], index: 19, kind: output, shape index: {1}]   ;;  %s4944_s20 = inlined_call_operand.hbm [shape: bf16[2,16,32], index: 20, kind: output, shape index: {2}]  }
   0x1   :  { %4949 = sst [smem:[#allocation13_spill]] %s4924_s0 }
   0x2   :  { %4950 = sst [smem:[#allocation14_spill]] %s4925_s1 }
   0x3   :  { %4951 = sst [smem:[#allocation15_spill]] %s4926_s2 }
   0x4   :  { %4952 = sst [smem:[#allocation16_spill]] %s4927_s3 }
   0x5   :  { %4953 = sst [smem:[#allocation17_spill]] %s4928_s4 }
   0x6   :  { %4954 = sst [smem:[#allocation18_spill]] %s4930_s6 }
   0x7   :  { %4955 = sst [smem:[#allocation19_spill]] %s4939_s15 }
   0x8   :  { %4956 = sst [smem:[#allocation20_spill]] %s4941_s17 }
   0x9   :  { %4957 = sst [smem:[#allocation21_spill]] %s4942_s18 }
   0xa   :  { %4958 = sst [smem:[#allocation22_spill]] %s4943_s19 }
   0xb   :  { %4959 = sst [smem:[#allocation23_spill]] %s4944_s20 }
   0xc   :  { %26 = vsyncpa [#allocation5], 0 }
   0xd   :  { %27 = vsyncpa [#allocation7], 0  ;;  %s4231_s1 = smov 0   ;;  %s4233_s22 = smov 0  }
   0xe   :  { %s4235_s23 = smov 0  }
   0xf LB: > { %4960 = sst [smem:[#allocation10_spill]] %s4099_s22  ;;  %s42_s2 = sadd.s32 1, %s4099_s22  ;;  %s4103_s23 = sphi %s4235_s23, %s33_s23   ;;  %s4099_s22 = sphi %s4233_s22, %s4986_s22   ;;  %s4095_s1 = sphi %s4231_s1, %s4985_s1  }
  0x10   : > { %4961 = sst [smem:[#allocation11_spill]] %s4103_s23  ;;  %p43_p0 = scmp.ge.s32.totalorder %s42_s2, 2 }
  0x11   : > { %p3389_p1 = scmp.ge.s32.totalorder %s4103_s23, 1  ;;  %p687_p2 = scmp.lt.s32.totalorder %s4103_s23, 3 }
  0x12   : > { %s4988_s2 = smov (%p43_p0, %s42_s2), 0 }
  0x13   : > { %4962 = sst [smem:[#allocation12_spill]] %s4988_s2  ;;  %p688_p3 = pnand %p3389_p1, %p687_p2 }
  0x14   : > { %p797_p4 = scmp.lt.s32.totalorder (!%p688_p3), %s4095_s1, 1  ;;  %s4965_s20 = sld [smem:[#allocation17_spill]] (!%p688_p3) }
  0x15   : > { %691 = sbr.rel (%p688_p3) target bundleno = 4789 (0x12b5), region = 92  ;;  %s4966_s6 = sld [smem:[#allocation18_spill]] (!%p688_p3) }
  0x16   : > { %p3398_p5 = scmp.ne.s32.totalorder (!%p688_p3), %s4095_s1, 0 }
  0x1a   : > { %s4254_s25 = scalar_select %p797_p4, %s4095_s1, 1 }
  0x1b   : > { %s4967_s3 = sld [smem:[#allocation13_spill]] (!%p3398_p5) }
  0x1c   : > { %s3480_s21 = sshll.u32 %s4254_s25, 4  ;;  %s821_s0 = scalar_lea.vmem %s4932_s8, %s4254_s25 }
  0x1d   : > { %s4272_s19 = scalar_lea.vmem %s4965_s20, %s3480_s21  ;;  %s4277_s17 = scalar_lea.vmem %s4966_s6, %s3480_s21 }
  0x1e   : > { %s824_s22 = scalar_lea.vmem %s4933_s9, %s4254_s25  ;;  %s4294_s26 = scalar_lea.vmem %s4934_s10, %s3480_s21 }
  0x1f   : > { %s832_s6 = scalar_lea.vmem %s4935_s11, %s4254_s25  ;;  %s3483_s15 = sshll.u32 %s4254_s25, 5 }
  0x20   : > { %s4304_s4 = scalar_lea.vmem %s4936_s12, %s3483_s15  ;;  %s840_s24 = scalar_lea.vmem %s4937_s13, %s4254_s25 }
  0x21   : > { %853 = sbr.rel (%p3398_p5) target bundleno = 43 (0x2b), region = 96  ;;  %s4968_s15 = sld [smem:[#allocation14_spill]] (!%p3398_p5) }
  0x26   : > { %v3489_v0 = vld [vmem:[%s4967_s3] sm:$0xff]   ;;  %vm862_vm0 = vcmask 261120   ;;  %v3496_v1 = vld [vmem:[%s4967_s3 + $0x8] sm:$0xff]  }
  0x27   : > { %v867_v2 = vld [vmem:[%s4968_s15] sm:$0xff]  ;;  %v3490_v3 = vunpack.c.l.bf16 %v3489_v0  ;;  %v3491_v4 = vunpack.c.h.bf16 %v3489_v0  ;;  %v3494_v5 = vunpack.c.l.bf16 %v3496_v1  ;;  %v3495_v6 = vunpack.c.h.bf16 %v3496_v1 }
  0x28   : > { %868 = vst.msk [vmem:[#allocation2] sm:$0xff] %vm862_vm0, %v867_v2  ;;  %869 = vst.msk [vmem:[#allocation2 + $0x18] sm:$0xff] %vm862_vm0, %v867_v2 }
  0x29   : > { %863 = vst.msk [vmem:[#allocation2 + $0x8] sm:$0xff] %vm862_vm0, %v3490_v3  ;;  %864 = vst.msk [vmem:[#allocation2 + $0x10] sm:$0xff] %vm862_vm0, %v3491_v4 }
  0x2a   : > { %865 = vst.msk [vmem:[#allocation2 + $0x20] sm:$0xff] %vm862_vm0, %v3494_v5  ;;  %866 = vst.msk [vmem:[#allocation2 + $0x28] sm:$0xff] %vm862_vm0, %v3495_v6 }
  0x2b PF: > { %vm878_vm1 = vcmask 261120   ;;  %v3871_v49 = vld [vmem:[%s4272_s19 + $0x8] sm:$0xff]   ;;  %v4105_v50 = vmov 0.0   ;;  %vm4106_vm2 = vmmov 0   ;;  %v3872_v51 = vld [vmem:[%s4272_s19] sm:$0xff]   ;;  %s4969_s29 = sld [smem:[#allocation15_spill]]  ;;  %s4973_s15 = scalar_lea.vmem %s4929_s5, %s4254_s25 }
  0x2c   : > { %3586 = vmatprep.subr.bf16.mxu1 %v4105_v50  ;;  %3590 = vmatprep.mubr.msk.bf16.mxu1 %vm4106_vm2, %v4105_v50  ;;  %s4971_s20 = sld [smem:[#allocation16_spill]]  ;;  %vm1084_vm3 = vcmask 64512   ;;  %s4107_s19 = smov 96   ;;  %vm1217_vm4 = vcmask 195584   ;;  %vm1299_vm5 = vcmask 1043456   ;;  %vm1779_vm6 = vcmask 130112  }
  0x2d   : > { %3587 = vmatpush3.bf16.msra.mxu1 %v3871_v49  ;;  %s4108_s27 = smov 64   ;;  %s4111_s2 = smov 56   ;;  %vm2146_vm7 = vcmask 195712   ;;  %vm2513_vm8 = vcmask 261312   ;;  %vm2916_vm9 = vcmask 523264  }
  0x2e   : > { %3588 = vmatprep.subr.bf16.mxu1 %v4105_v50  ;;  %s4112_s21 = smov 80   ;;  %s4115_s23 = smov 72  }
  0x2f   : > { %v870_v7 = vld [vmem:[#allocation2] sm:$0xff]  ;;  %v873_v12 = vld [vmem:[#allocation2 + $0x18] sm:$0xff]  ;;  %s4116_s28 = smov 104   ;;  %p3461_p6 = scmp.ne.s32.totalorder %s4095_s1, 1 }
  0x30   : > { %v872_v8 = vld [vmem:[#allocation2 + $0x10] sm:$0xff]  ;;  %v871_v9 = vld [vmem:[#allocation2 + $0x8] sm:$0xff]  ;;  %v879_v10 = vsel %vm878_vm1, %v870_v7, 0.0  ;;  %v888_v16 = vsel %vm878_vm1, %v873_v12, 0.0 }
  0x31   : > { %v885_v11 = vsel %vm878_vm1, %v872_v8, 0.0  ;;  %v874_v13 = vld [vmem:[#allocation2 + $0x20] sm:$0xff]  ;;  %v875_v14 = vld [vmem:[#allocation2 + $0x28] sm:$0xff]  ;;  %880 = vadd.xlane.f32.xlu0 %v879_v10  ;;  %v882_v15 = vsel %vm878_vm1, %v871_v9, 0.0  ;;  %3589 = vmatpush3.bf16.msra.mxu1 %v3872_v51  ;;  %s4970_s30 = scalar_lea.vmem %s4969_s29, %s4254_s25  ;;  %s4109_s29 = smov 88  }
  0x32   : > { %886 = vadd.xlane.f32.xlu1 %v885_v11  ;;  %v891_v17 = vsel %vm878_vm1, %v874_v13, 0.0  ;;  %v894_v18 = vsel %vm878_vm1, %v875_v14, 0.0  ;;  %s4972_s18 = scalar_lea.vmem %s4971_s20, %s4254_s25  ;;  %s4113_s20 = smov 112  }
  0x35   : > { %883 = vadd.xlane.f32.xlu0 %v882_v15 }
  0x36   : > { %889 = vadd.xlane.f32.xlu1 %v888_v16 }
  0x39   : > { %892 = vadd.xlane.f32.xlu0 %v891_v17 }
  0x3a   : > { %895 = vadd.xlane.f32.xlu1 %v894_v18 }
  0xba   : > { %v881_v19 = vpop.xlane.xlu0 %880 }
  0xbb   : > { %v887_v20 = vpop.xlane.xlu1 %886  ;;  %v898_v21 = vmul.f32 0.03125, %v881_v19 }
  0xbc   : > { %v900_v22 = vmul.f32 0.03125, %v887_v20 }
  0xbd   : > { %v4326_v23 = vsub.f32 %v870_v7, %v898_v21 }
  0xbe   : > { %v4328_v24 = vsub.f32 %v872_v8, %v900_v22  ;;  %v884_v25 = vpop.xlane.xlu0 %883  ;;  %v3399_v8 = vld [vmem:[%s4970_s30] ss:$0 sm:$0xff]  ;;  %s4110_s30 = smov 120  }
  0xbf   : > { %v890_v26 = vpop.xlane.xlu1 %889  ;;  %v899_v27 = vmul.f32 0.03125, %v884_v25  ;;  %v910_v29 = vmul.f32 %v4326_v23, %v4326_v23 }
  0xc0   : > { %v901_v28 = vmul.f32 0.03125, %v890_v26  ;;  %v912_v30 = vmul.f32 %v4328_v24, %v4328_v24 }
  0xc1   : > { %v905_v31 = vsub.f32 %v871_v9, %v899_v27  ;;  %v916_v33 = vsel %vm878_vm1, %v910_v29, 0.0 }
  0xc2   : > { %v4334_v32 = vsub.f32 %v873_v12, %v901_v28  ;;  %917 = vadd.xlane.f32.xlu0 %v916_v33  ;;  %v893_v34 = vpop.xlane.xlu0 %892  ;;  %v922_v36 = vsel %vm878_vm1, %v912_v30, 0.0 }
  0xc3   : > { %v896_v35 = vpop.xlane.xlu1 %895  ;;  %v902_v37 = vmul.f32 0.03125, %v893_v34  ;;  %v911_v39 = vmul.f32 %v905_v31, %v905_v31 }
  0xc4   : > { %v903_v38 = vmul.f32 0.03125, %v896_v35  ;;  %v913_v40 = vmul.f32 %v4334_v32, %v4334_v32 }
  0xc5   : > { %v4340_v41 = vsub.f32 %v874_v13, %v902_v37  ;;  %v919_v43 = vsel %vm878_vm1, %v911_v39, 0.0  ;;  %v3400_v13 = vld [vmem:[%s4972_s18] ss:$0 sm:$0xff]  ;;  %s4114_s18 = smov 48  }
  0xc6   : > { %v4342_v42 = vsub.f32 %v875_v14, %v903_v38  ;;  %923 = vadd.xlane.f32.xlu0 %v922_v36  ;;  %920 = vadd.xlane.f32.xlu1 %v919_v43  ;;  %v925_v44 = vsel %vm878_vm1, %v913_v40, 0.0  ;;  %v3401_v36 = vld [vmem:[%s4973_s15] ss:$0 sm:$0xff]  ;;  %s4117_s15 = smov 40  }
  0xc7   : > { %v914_v45 = vmul.f32 %v4340_v41, %v4340_v41 }
  0xc8   : > { %v915_v46 = vmul.f32 %v4342_v42, %v4342_v42 }
  0xc9   : > { %v928_v47 = vsel %vm878_vm1, %v914_v45, 0.0 }
  0xca   : > { %926 = vadd.xlane.f32.xlu1 %v925_v44  ;;  %929 = vadd.xlane.f32.xlu0 %v928_v47  ;;  %v931_v48 = vsel %vm878_vm1, %v915_v46, 0.0 }
  0xce   : > { %932 = vadd.xlane.f32.xlu1 %v931_v48 }
 0x14b   : > { %v918_v52 = vpop.xlane.xlu0 %917 }
 0x14c   : > { %v934_v53 = vmul.f32 0.03125, %v918_v52 }
 0x14e   : > { %v940_v54 = vadd.f32 1e-05, %v934_v53 }
 0x14f   : > { %v921_v55 = vpop.xlane.xlu1 %920  ;;  %v924_v56 = vpop.xlane.xlu0 %923 }
 0x150   : > { %3881 = vrsqrt.f32 %v940_v54  ;;  %v935_v57 = vmul.f32 0.03125, %v921_v55  ;;  %v936_v58 = vmul.f32 0.03125, %v924_v56 }
 0x152   : > { %v941_v59 = vadd.f32 1e-05, %v935_v57  ;;  %v942_v60 = vadd.f32 1e-05, %v936_v58 }
 0x153   : > { %v927_v61 = vpop.xlane.xlu1 %926  ;;  %v930_v62 = vpop.xlane.xlu0 %929 }
 0x154   : > { %3883 = vrsqrt.f32 %v941_v59  ;;  %v937_v63 = vmul.f32 0.03125, %v927_v61  ;;  %v938_v1 = vmul.f32 0.03125, %v930_v62 }
 0x155   : > { %3885 = vrsqrt.f32 %v942_v60 }
 0x156   : > { %v943_v0 = vadd.f32 1e-05, %v937_v63  ;;  %v944_v4 = vadd.f32 1e-05, %v938_v1 }
 0x157   : > { %v933_v2 = vpop.xlane.xlu1 %932 }
 0x158   : > { %3887 = vrsqrt.f32 %v943_v0  ;;  %v939_v3 = vmul.f32 0.03125, %v933_v2 }
 0x15a   : > { %v945_v5 = vadd.f32 1e-05, %v939_v3 }
 0x15c   : > { %3889 = vrsqrt.f32 %v945_v5 }
 0x15d   : > { %v3882_v6 = vpop.eup %3881  ;;  %3891 = vrsqrt.f32 %v944_v4 }
 0x15e   : > { %v952_v7 = vmul.f32 %v3882_v6, %v4326_v23 }
 0x160   : > { %v964_v11 = vmul.f32 %v3399_v8, %v952_v7 }
 0x161   : > { %v3884_v9 = vpop.eup %3883 }
 0x162   : > { %v953_v10 = vmul.f32 %v3884_v9, %v905_v31  ;;  %v3886_v12 = vpop.eup %3885  ;;  %v976_v16 = vadd.f32 %v3400_v13, %v964_v11 }
 0x163   : > { %v954_v18 = vmul.f32 %v3886_v12, %v4328_v24 }
 0x164   : > { %v965_v14 = vmul.f32 %v3399_v8, %v953_v10 }
 0x165   : > { %v3888_v15 = vpop.eup %3887  ;;  %v966_v23 = vmul.f32 %v3399_v8, %v954_v18 }
 0x166   : > { %v977_v17 = vadd.f32 %v3400_v13, %v965_v14  ;;  %v955_v19 = vmul.f32 %v3888_v15, %v4334_v32 }
 0x167   : > { %v978_v28 = vadd.f32 %v3400_v13, %v966_v23 }
 0x168   : > { %v982_v20 = vpack.c.bf16 %v977_v17, %v976_v16  ;;  %v967_v21 = vmul.f32 %v3399_v8, %v955_v19 }
 0x169   : > { %v3890_v22 = vpop.eup %3889 }
 0x16a   : > { %3591 = vmatmul.mubr.msk.bf16.vlgmr.msra.gmra.mxu1 %vm878_vm1, %v982_v20  ;;  %v3892_v25 = vpop.eup %3891  ;;  %v979_v26 = vadd.f32 %v3400_v13, %v967_v21  ;;  %v957_v27 = vmul.f32 %v3890_v22, %v4342_v42 }
 0x16b   : > { %3594 = vmatprep.mubr.msk.bf16.mxu1 %vm4106_vm2, %v4105_v50  ;;  %v956_v29 = vmul.f32 %v3892_v25, %v4340_v41 }
 0x16c   : > { %v983_v24 = vpack.c.bf16 %v979_v26, %v978_v28  ;;  %v969_v30 = vmul.f32 %v3399_v8, %v957_v27 }
 0x16d   : > { %v968_v31 = vmul.f32 %v3399_v8, %v956_v29 }
 0x16e   : > { %v981_v32 = vadd.f32 %v3400_v13, %v969_v30 }
 0x16f   : > { %v980_v33 = vadd.f32 %v3400_v13, %v968_v31 }
 0x171   : > { %v984_v34 = vpack.c.bf16 %v981_v32, %v980_v33 }
 0x172   : > { %3595 = vmatmul.mubr.msk.bf16.gmra.mxu1 %vm878_vm1, %v983_v24 }
 0x173   : > { %3598 = vmatprep.mubr.msk.bf16.mxu1 %vm4106_vm2, %v4105_v50 }
 0x17a   : > { %3599 = vmatmul.mubr.msk.bf16.gmra.mxu1 %vm878_vm1, %v984_v34 }
 0x22a   : > { %v1051_v35 = vpop.f32.mrf.mxu1 }
 0x22b   : > { %v1052_v39 = vadd.f32 %v3401_v36, %v1051_v35 }
 0x22c   : > { %v3592_v37 = vpop.f32.mrf.mxu1 }
 0x22e   : > { %v1054_v38 = vpop.f32.mrf.mxu1 }
 0x22f   : > { %v1055_v40 = vadd.f32 %v3401_v36, %v1054_v38 }
 0x230   : > { %v3593_v41 = vpop.f32.mrf.mxu1 }
 0x231   : > { %v4385_v42 = vpack.c.bf16 %v1055_v40, %v1052_v39 }
 0x232   : > { %v1059_v43 = vpop.f32.mrf.mxu1 }
 0x233   : > { %v1060_v44 = vadd.f32 %v3401_v36, %v1059_v43  ;;  %1080 = vrot.lane.b32.xlu1 %v4385_v42, %s4107_s19  ;;  %3606 = vmatprep.mubr.msk.bf16.mxu1 %vm1084_vm3, %v4385_v42 }
 0x234   : > { %v3596_v45 = vpop.f32.mrf.mxu1 }
 0x235   : > { %v4390_v46 = vpack.c.bf16 %v1060_v44, %v1060_v44 }
 0x236   : > { %v1062_v47 = vpop.f32.mrf.mxu1 }
 0x237   : > { %1082 = vrot.lane.b32.xlu0 %v4390_v46, %s4107_s19  ;;  %v1063_v51 = vadd.f32 %v3401_v36, %v1062_v47 }
 0x238   : > { %v3597_v48 = vpop.f32.mrf.mxu1 }
 0x23a   : > { %v1067_v49 = vpop.f32.mrf.mxu1 }
 0x23b   : > { %v1068_v52 = vadd.f32 %v3401_v36, %v1067_v49 }
 0x23c   : > { %v3600_v53 = vpop.f32.mrf.mxu1 }
 0x23d   : > { %v4393_v54 = vpack.c.bf16 %v1068_v52, %v1063_v51 }
 0x23e   : > { %v1070_v55 = vpop.f32.mrf.mxu1 }
 0x23f   : > { %v1071_v56 = vadd.f32 %v3401_v36, %v1070_v55  ;;  %3614 = vmatprep.mubr.msk.bf16.mxu0 %vm1084_vm3, %v4393_v54 }
 0x240   : > { %v3601_v57 = vpop.f32.mrf.mxu1 }
 0x241   : > { %v4397_v58 = vpack.c.bf16 %v1071_v56, %v1071_v56 }
 0x243   : > { %1149 = vrot.lane.b32.xlu1 %v4397_v58, %s4107_s19 }
 0x247   : > { %1147 = vrot.lane.b32.xlu1 %v4393_v54, %s4107_s19  ;;  %s4118_s19 = smov 8  }
 0x2a5   : > { %v1081_v61 = vpop.permute.xlu1 %1080 }
 0x2a6   : > { %v1092_v62 = vsel %vm1084_vm3, %v1081_v61, 0 }
 0x2a9   : > { %v1083_v59 = vpop.permute.xlu0 %1082 }
 0x2aa   : > { %3790 = vmatprep.subr.msk.bf16.mxu1 %vm1084_vm3, %v1083_v59  ;;  %v1095_v60 = vsel %vm1084_vm3, %v1083_v59, 0 }
 0x2ab   : > { %3603 = vmatpush3.bf16.xpose.msra.mxu1 %v1095_v60 }
 0x2ac   : > { %3791 = vmatprep.subr.msk.bf16.mxu1 %vm1084_vm3, %v1081_v61 }
 0x2b3   : > { %3605 = vmatpush3.bf16.xpose.msra.mxu1 %v1092_v62 }
 0x2b5   : > { %v1150_v63 = vpop.permute.xlu1 %1149 }
 0x2b6   : > { %3792 = vmatprep.subr.msk.bf16.mxu0 %vm1084_vm3, %v1150_v63  ;;  %v1161_v0 = vsel %vm1084_vm3, %v1150_v63, 0 }
 0x2b7   : > { %3611 = vmatpush3.bf16.xpose.msra.mxu0 %v1161_v0 }
 0x2b9   : > { %v1148_v1 = vpop.permute.xlu1 %1147 }
 0x2ba   : > { %3607 = vmatmul.mubr.msk.bf16.vlgmr.msra.gmra.mxu1 %vm1084_vm3, %v4390_v46  ;;  %3793 = vmatprep.subr.msk.bf16.mxu0 %vm1084_vm3, %v1148_v1  ;;  %v1158_v2 = vsel %vm1084_vm3, %v1148_v1, 0 }
 0x2bf   : > { %3613 = vmatpush3.bf16.xpose.msra.mxu0 %v1158_v2 }
 0x2c6   : > { %3615 = vmatmul.mubr.msk.bf16.vlgmr.msra.gmra.mxu0 %vm1084_vm3, %v4397_v58 }
 0x37a   : > { %v3608_v3 = vpop.f32.mrf.mxu1 }
 0x37b   : > { %v1213_v7 = vmul.f32 0.35355338, %v3608_v3 }
 0x37c   : > { %v1131_v4 = vpop.f32.mrf.mxu1 }
 0x37d   : > { %v1211_v5 = vmul.f32 0.35355338, %v1131_v4  ;;  %v1224_v11 = vsel %vm1217_vm4, %v1213_v7, -inf }
 0x37e   : > { %v3609_v6 = vpop.f32.mrf.mxu1 }
 0x37f   : > { %v1218_v8 = vsel %vm1217_vm4, %v1211_v5, -inf }
 0x380   : > { %1219 = vmax.xlane.f32.xlu0 %v1218_v8  ;;  %v1134_v9 = vpop.f32.mrf.mxu1 }
 0x381   : > { %v1212_v10 = vmul.f32 0.35355338, %v1134_v9 }
 0x383   : > { %v1221_v12 = vsel %vm1217_vm4, %v1212_v10, -inf }
 0x384   : > { %1225 = vmax.xlane.f32.xlu0 %v1224_v11  ;;  %1222 = vmax.xlane.f32.xlu1 %v1221_v12 }
 0x386   : > { %v3616_v13 = vpop.f32.mrf.mxu0 }
 0x387   : > { %v1216_v14 = vmul.f32 0.35355338, %v3616_v13 }
 0x388   : > { %v1197_v15 = vpop.f32.mrf.mxu0 }
 0x389   : > { %v1214_v16 = vmul.f32 0.35355338, %v1197_v15  ;;  %v1233_v17 = vsel %vm1217_vm4, %v1216_v14, -inf }
 0x38a   : > { %v3617_v18 = vpop.f32.mrf.mxu0  ;;  %1234 = vmax.xlane.f32.xlu1 %v1233_v17 }
 0x38b   : > { %v1227_v19 = vsel %vm1217_vm4, %v1214_v16, -inf }
 0x38c   : > { %v1200_v20 = vpop.f32.mrf.mxu0  ;;  %1228 = vmax.xlane.f32.xlu0 %v1227_v19 }
 0x38d   : > { %v4418_v21 = vmul.f32 0.35355338, %v1200_v20 }
 0x38f   : > { %v1230_v22 = vsel %vm1217_vm4, %v4418_v21, -inf }
 0x390   : > { %1231 = vmax.xlane.f32.xlu0 %v1230_v22 }
 0x39b   : > { %1288 = vrot.lane.b32.xlu1 %v4385_v42, %s4108_s27 }
 0x39f   : > { %1425 = vrot.lane.b32.xlu1 %v4390_v46, %s4109_s29 }
 0x3a3   : > { %1353 = vrot.lane.b32.xlu1 %v4397_v58, %s4108_s27 }
 0x3a6   : > { %1290 = vrot.lane.b32.xlu0 %v4390_v46, %s4108_s27 }
 0x3a7   : > { %1423 = vrot.lane.b32.xlu1 %v4385_v42, %s4109_s29 }
 0x409   : > { %v1220_v23 = vpop.xlane.xlu0 %1219 }
 0x40a   : > { %v1236_v25 = vsub.f32 %v1211_v5, %v1220_v23 }
 0x40c   : > { %v1242_v24 = vmul.f32 1.442695, %v1236_v25 }
 0x40d   : > { %v1226_v26 = vpop.xlane.xlu0 %1225  ;;  %v1223_v27 = vpop.xlane.xlu1 %1222 }
 0x40e   : > { %v1238_v28 = vsub.f32 %v1213_v7, %v1226_v26  ;;  %v1237_v29 = vsub.f32 %v1212_v10, %v1223_v27 }
 0x410   : > { %v1246_v30 = vmul.f32 1.442695, %v1238_v28  ;;  %v1244_v31 = vmul.f32 1.442695, %v1237_v29 }
 0x412   : > { %3893 = vpow2.f32 %v1246_v30 }
 0x413   : > { %3895 = vpow2.f32 %v1244_v31  ;;  %v1235_v32 = vpop.xlane.xlu1 %1234 }
 0x414   : > { %3897 = vpow2.f32 %v1242_v24  ;;  %v1241_v33 = vsub.f32 %v1216_v14, %v1235_v32 }
 0x415   : > { %v1229_v34 = vpop.xlane.xlu0 %1228 }
 0x416   : > { %v1252_v35 = vmul.f32 1.442695, %v1241_v33  ;;  %v1239_v36 = vsub.f32 %v1214_v16, %v1229_v34 }
 0x417   : > { %v1289_v37 = vpop.permute.xlu1 %1288 }
 0x418   : > { %3899 = vpow2.f32 %v1252_v35  ;;  %v1248_v38 = vmul.f32 1.442695, %v1239_v36 }
 0x419   : > { %v1232_v39 = vpop.xlane.xlu0 %1231 }
 0x41a   : > { %3901 = vpow2.f32 %v1248_v38  ;;  %v1240_v62 = vsub.f32 %v4418_v21, %v1232_v39 }
 0x41b   : > { %v1426_v40 = vpop.permute.xlu1 %1425 }
 0x41c   : > { %3796 = vmatprep.subr.msk.bf16.mxu0 %vm1084_vm3, %v1426_v40  ;;  %v1437_v41 = vsel %vm1084_vm3, %v1426_v40, 0  ;;  %v1250_v63 = vmul.f32 1.442695, %v1240_v62 }
 0x41d   : > { %v1291_v43 = vpop.permute.xlu0 %1290  ;;  %3635 = vmatpush3.bf16.xpose.msra.mxu0 %v1437_v41 }
 0x41e   : > { %3794 = vmatprep.subr.msk.bf16.mxu1 %vm1299_vm5, %v1291_v43  ;;  %v1301_v44 = vsel %vm1299_vm5, %v1291_v43, 0  ;;  %3903 = vpow2.f32 %v1250_v63 }
 0x41f   : > { %v3894_v45 = vpop.eup %3893  ;;  %3619 = vmatpush3.bf16.msra.mxu1 %v1301_v44  ;;  %v1354_v47 = vpop.permute.xlu1 %1353 }
 0x420   : > { %v3896_v48 = vpop.eup %3895  ;;  %3620 = vmatprep.subr.bf16.mxu1 %v1289_v37  ;;  %v1260_v49 = vsel %vm1217_vm4, %v3894_v45, 0.0  ;;  %v1363_v16 = vsel %vm1299_vm5, %v1354_v47, 0 }
 0x421   : > { %v3898_v51 = vpop.eup %3897  ;;  %1261 = vadd.xlane.f32.xlu0 %v1260_v49  ;;  %v1257_v52 = vsel %vm1217_vm4, %v3896_v48, 0.0 }
 0x422   : > { %1258 = vadd.xlane.f32.xlu1 %v1257_v52  ;;  %v1254_v55 = vsel %vm1217_vm4, %v3898_v51, 0.0 }
 0x423   : > { %3621 = vmatpush3.bf16.msra.mxu1 %v1289_v37  ;;  %v1424_v53 = vpop.permute.xlu1 %1423 }
 0x424   : > { %3795 = vmatprep.subr.msk.bf16.mxu1 %vm1299_vm5, %v1354_v47  ;;  %3797 = vmatprep.subr.msk.bf16.mxu0 %vm1084_vm3, %v1424_v53  ;;  %v1434_v56 = vsel %vm1084_vm3, %v1424_v53, 0 }
 0x425   : > { %v3900_v57 = vpop.eup %3899  ;;  %1255 = vadd.xlane.f32.xlu0 %v1254_v55  ;;  %3637 = vmatpush3.bf16.xpose.msra.mxu0 %v1434_v56 }
 0x426   : > { %v1269_v59 = vsel %vm1217_vm4, %v3900_v57, 0.0 }
 0x427   : > { %v3902_v60 = vpop.eup %3901  ;;  %1270 = vadd.xlane.f32.xlu1 %v1269_v59 }
 0x428   : > { %v1263_v61 = vsel %vm1217_vm4, %v3902_v60, 0.0 }
 0x42b   : > { %1264 = vadd.xlane.f32.xlu1 %v1263_v61  ;;  %v3904_v0 = vpop.eup %3903 }
 0x42c   : > { %v1266_v1 = vsel %vm1217_vm4, %v3904_v0, 0.0 }
 0x43b   : > { %1351 = vrot.lane.b32.xlu0 %v4393_v54, %s4108_s27 }
 0x43c   : > { %1419 = vrot.lane.b32.xlu1 %v4385_v42, %s4110_s30 }
 0x440   : > { %1491 = vrot.lane.b32.xlu1 %v4393_v54, %s4109_s29 }
 0x444   : > { %1489 = vrot.lane.b32.xlu1 %v4397_v58, %s4110_s30 }
 0x45a   : > { %1267 = vadd.xlane.f32.xlu0 %v1266_v1 }
 0x470   : > { %1493 = vrot.lane.b32.xlu0 %v4397_v58, %s4109_s29  ;;  %s4119_s29 = smov 16  }
 0x474   : > { %1421 = vrot.lane.b32.xlu0 %v4390_v46, %s4110_s30 }
 0x478   : > { %1487 = vrot.lane.b32.xlu0 %v4393_v54, %s4110_s30  ;;  %s4120_s30 = smov 24  }
 0x4aa   : > { %v1262_v2 = vpop.xlane.xlu0 %1261 }
 0x4ab   : > { %v1259_v3 = vpop.xlane.xlu1 %1258  ;;  %3905 = vrcp.f32 %v1262_v2 }
 0x4ac   : > { %3907 = vrcp.f32 %v1259_v3 }
 0x4ae   : > { %v1256_v4 = vpop.xlane.xlu0 %1255 }
 0x4af   : > { %3909 = vrcp.f32 %v1256_v4 }
 0x4b0   : > { %v1271_v5 = vpop.xlane.xlu1 %1270 }
 0x4b1   : > { %3911 = vrcp.f32 %v1271_v5 }
 0x4b2   : > { %v1352_v17 = vpop.permute.xlu0 %1351 }
 0x4b4   : > { %v1265_v6 = vpop.xlane.xlu1 %1264 }
 0x4b5   : > { %3913 = vrcp.f32 %v1265_v6 }
 0x4b8   : > { %v1420_v7 = vpop.permute.xlu1 %1419  ;;  %v3906_v8 = vpop.eup %3905 }
 0x4b9   : > { %3638 = vmatprep.mubr.msk.bf16.mxu0 %vm1084_vm3, %v1420_v7  ;;  %v3908_v9 = vpop.eup %3907  ;;  %v1280_v11 = vmul.f32 %v3906_v8, %v3894_v45 }
 0x4ba   : > { %v1279_v13 = vmul.f32 %v3908_v9, %v3896_v48 }
 0x4bb   : > { %v1285_v15 = vpack.c.bf16 %v1280_v11, %v1280_v11 }
 0x4bc   : > { %v3910_v10 = vpop.eup %3909  ;;  %v1492_v31 = vpop.permute.xlu1 %1491 }
 0x4bd   : > { %v1278_v12 = vmul.f32 %v3910_v10, %v3898_v51  ;;  %v1502_v32 = vsel %vm1084_vm3, %v1492_v31, 0 }
 0x4be   : > { %v3912_v21 = vpop.eup %3911 }
 0x4bf   : > { %v1284_v14 = vpack.c.bf16 %v1279_v13, %v1278_v12  ;;  %v1283_v25 = vmul.f32 %v3912_v21, %v3900_v57 }
 0x4c0   : > { %v1490_v33 = vpop.permute.xlu1 %1489 }
 0x4c1   : > { %3622 = vmatprep.mubr.msk.bf16.mxu1 %vm1217_vm4, %v1284_v14  ;;  %v1287_v29 = vpack.c.bf16 %v1283_v25, %v1283_v25 }
 0x4c2   : > { %3623 = vmatmul.mubr.msk.bf16.vlgmr.msra.gmra.mxu1 %vm1217_vm4, %v1285_v15  ;;  %v3914_v22 = vpop.eup %3913 }
 0x4c3   : > { %3627 = vmatpush3.bf16.msra.mxu1 %v1363_v16  ;;  %v1281_v26 = vmul.f32 %v3914_v22, %v3902_v60 }
 0x4c4   : > { %3628 = vmatprep.subr.bf16.mxu1 %v1352_v17 }
 0x4c7   : > { %3629 = vmatpush3.bf16.msra.mxu1 %v1352_v17 }
 0x4e3   : > { %v1268_v18 = vpop.xlane.xlu0 %1267 }
 0x4e4   : > { %3915 = vrcp.f32 %v1268_v18 }
 0x4e7   : > { %v1494_v19 = vpop.permute.xlu0 %1493 }
 0x4e8   : > { %3798 = vmatprep.subr.msk.bf16.mxu1 %vm1084_vm3, %v1494_v19  ;;  %v1505_v30 = vsel %vm1084_vm3, %v1494_v19, 0 }
 0x4eb   : > { %v1422_v20 = vpop.permute.xlu0 %1421 }
 0x4ec   : > { %3639 = vmatmul.mubr.msk.bf16.vlgmr.msra.gmra.mxu0 %vm1084_vm3, %v1422_v20 }
 0x4ef   : > { %v1488_v24 = vpop.permute.xlu0 %1487 }
 0x4f1   : > { %v3916_v23 = vpop.eup %3915 }
 0x4f2   : > { %v1282_v27 = vmul.f32 %v3916_v23, %v3904_v0 }
 0x4f4   : > { %v1286_v28 = vpack.c.bf16 %v1282_v27, %v1281_v26 }
 0x4f6   : > { %3630 = vmatprep.mubr.msk.bf16.mxu1 %vm1217_vm4, %v1286_v28 }
 0x4f7   : > { %3631 = vmatmul.mubr.msk.bf16.vlgmr.msra.gmra.mxu1 %vm1217_vm4, %v1287_v29 }
 0x4f8   : > { %3643 = vmatpush3.bf16.xpose.msra.mxu1 %v1505_v30  ;;  %3646 = vmatprep.mubr.msk.bf16.mxu1 %vm1084_vm3, %v1488_v24 }
 0x4f9   : > { %3799 = vmatprep.subr.msk.bf16.mxu1 %vm1084_vm3, %v1492_v31 }
 0x500   : > { %3645 = vmatpush3.bf16.xpose.msra.mxu1 %v1502_v32 }
 0x507   : > { %3647 = vmatmul.mubr.msk.bf16.vlgmr.msra.gmra.mxu1 %vm1084_vm3, %v1490_v33 }
 0x582   : > { %v3624_v34 = vpop.f32.mrf.mxu1 }
 0x583   : > { %1415 = vst.msk [vmem:[#allocation3 + $0x10] sm:$0xff] %vm1084_vm3, %v3624_v34 }
 0x584   : > { %v1337_v35 = vpop.f32.mrf.mxu1 }
 0x585   : > { %1413 = vst.msk [vmem:[#allocation3] sm:$0xff] %vm1084_vm3, %v1337_v35 }
 0x586   : > { %v3625_v36 = vpop.f32.mrf.mxu1 }
 0x588   : > { %v1340_v37 = vpop.f32.mrf.mxu1 }
 0x589   : > { %1414 = vst.msk [vmem:[#allocation3 + $0x8] sm:$0xff] %vm1084_vm3, %v1340_v37 }
 0x5ac   : > { %v3640_v38 = vpop.f32.mrf.mxu0 }
 0x5ad   : > { %v1557_v43 = vmul.f32 0.35355338, %v3640_v38 }
 0x5ae   : > { %v1473_v39 = vpop.f32.mrf.mxu0 }
 0x5af   : > { %v1555_v40 = vmul.f32 0.35355338, %v1473_v39  ;;  %v1567_v48 = vsel %vm1217_vm4, %v1557_v43, -inf }
 0x5b0   : > { %v3641_v41 = vpop.f32.mrf.mxu0 }
 0x5b1   : > { %v1561_v44 = vsel %vm1217_vm4, %v1555_v40, -inf }
 0x5b2   : > { %1562 = vmax.xlane.f32.xlu0 %v1561_v44  ;;  %v1476_v45 = vpop.f32.mrf.mxu0 }
 0x5b3   : > { %v1556_v47 = vmul.f32 0.35355338, %v1476_v45 }
 0x5b5   : > { %v1564_v49 = vsel %vm1217_vm4, %v1556_v47, -inf }
 0x5b6   : > { %1568 = vmax.xlane.f32.xlu0 %v1567_v48  ;;  %1565 = vmax.xlane.f32.xlu1 %v1564_v49 }
 0x5b7   : > { %v3632_v51 = vpop.f32.mrf.mxu1 }
 0x5b8   : > { %1418 = vst.msk [vmem:[#allocation3 + $0x28] sm:$0xff] %vm1084_vm3, %v3632_v51 }
 0x5b9   : > { %v1399_v52 = vpop.f32.mrf.mxu1 }
 0x5ba   : > { %1416 = vst.msk [vmem:[#allocation3 + $0x18] sm:$0xff] %vm1084_vm3, %v1399_v52 }
 0x5bb   : > { %v3633_v53 = vpop.f32.mrf.mxu1 }
 0x5bd   : > { %v1402_v55 = vpop.f32.mrf.mxu1 }
 0x5be   : > { %1417 = vst.msk [vmem:[#allocation3 + $0x20] sm:$0xff] %vm1084_vm3, %v1402_v55 }
 0x5c7   : > { %v3648_v56 = vpop.f32.mrf.mxu1 }
 0x5c8   : > { %v1560_v57 = vmul.f32 0.35355338, %v3648_v56 }
 0x5c9   : > { %v1541_v59 = vpop.f32.mrf.mxu1 }
 0x5ca   : > { %v1558_v60 = vmul.f32 0.35355338, %v1541_v59  ;;  %v1576_v61 = vsel %vm1217_vm4, %v1560_v57, -inf }
 0x5cb   : > { %1577 = vmax.xlane.f32.xlu1 %v1576_v61  ;;  %v3649_v62 = vpop.f32.mrf.mxu1 }
 0x5cc   : > { %v1570_v63 = vsel %vm1217_vm4, %v1558_v60, -inf }
 0x5cd   : > { %1571 = vmax.xlane.f32.xlu0 %v1570_v63  ;;  %v1544_v0 = vpop.f32.mrf.mxu1 }
 0x5ce   : > { %v1559_v1 = vmul.f32 0.35355338, %v1544_v0 }
 0x5d0   : > { %v1573_v2 = vsel %vm1217_vm4, %v1559_v1, -inf }
 0x5d1   : > { %1574 = vmax.xlane.f32.xlu0 %v1573_v2 }
 0x63b   : > { %v1563_v3 = vpop.xlane.xlu0 %1562 }
 0x63c   : > { %v1579_v4 = vsub.f32 %v1555_v40, %v1563_v3 }
 0x63e   : > { %v1585_v5 = vmul.f32 1.442695, %v1579_v4 }
 0x63f   : > { %v1569_v6 = vpop.xlane.xlu0 %1568  ;;  %v1566_v7 = vpop.xlane.xlu1 %1565 }
 0x640   : > { %3917 = vpow2.f32 %v1585_v5  ;;  %v1581_v8 = vsub.f32 %v1557_v43, %v1569_v6  ;;  %v1580_v9 = vsub.f32 %v1556_v47, %v1566_v7 }
 0x642   : > { %v1589_v10 = vmul.f32 1.442695, %v1581_v8  ;;  %v1587_v11 = vmul.f32 1.442695, %v1580_v9 }
 0x644   : > { %3919 = vpow2.f32 %v1589_v10 }
 0x645   : > { %3921 = vpow2.f32 %v1587_v11 }
 0x64d   : > { %v4481_v12 = vpop.eup %3917 }
 0x64e   : > { %v1597_v13 = vsel %vm1217_vm4, %v4481_v12, 0.0 }
 0x64f   : > { %1598 = vadd.xlane.f32.xlu0 %v1597_v13 }
 0x651   : > { %v4485_v14 = vpop.eup %3919 }
 0x652   : > { %v4487_v15 = vpop.eup %3921  ;;  %v1603_v16 = vsel %vm1217_vm4, %v4485_v14, 0.0 }
 0x653   : > { %1604 = vadd.xlane.f32.xlu0 %v1603_v16  ;;  %v1600_v17 = vsel %vm1217_vm4, %v4487_v15, 0.0 }
 0x654   : > { %1601 = vadd.xlane.f32.xlu1 %v1600_v17  ;;  %v1578_v22 = vpop.xlane.xlu1 %1577 }
 0x655   : > { %v1584_v23 = vsub.f32 %v1560_v57, %v1578_v22 }
 0x656   : > { %v1572_v18 = vpop.xlane.xlu0 %1571 }
 0x657   : > { %v1595_v25 = vmul.f32 1.442695, %v1584_v23  ;;  %v1582_v26 = vsub.f32 %v1558_v60, %v1572_v18 }
 0x659   : > { %v1591_v27 = vmul.f32 1.442695, %v1582_v26 }
 0x65a   : > { %v1575_v19 = vpop.xlane.xlu0 %1574 }
 0x65b   : > { %v1583_v20 = vsub.f32 %v1559_v1, %v1575_v19 }
 0x65d   : > { %v1593_v21 = vmul.f32 1.442695, %v1583_v20 }
 0x65f   : > { %3923 = vpow2.f32 %v1593_v21 }
 0x660   : > { %3925 = vpow2.f32 %v1595_v25 }
 0x661   : > { %3927 = vpow2.f32 %v1591_v27 }
 0x665   : > { %1631 = vrot.lane.b32.xlu1 %v4385_v42, %s4111_s2 }
 0x669   : > { %1792 = vrot.lane.b32.xlu1 %v4390_v46, %s4112_s21  ;;  %1633 = vrot.lane.b32.xlu0 %v4390_v46, %s4111_s2 }
 0x66c   : > { %v4501_v28 = vpop.eup %3923 }
 0x66d   : > { %1695 = vrot.lane.b32.xlu1 %v4397_v58, %s4111_s2  ;;  %1693 = vrot.lane.b32.xlu0 %v4393_v54, %s4111_s2  ;;  %v1609_v29 = vsel %vm1217_vm4, %v4501_v28, 0.0  ;;  %v4505_v24 = vpop.eup %3925 }
 0x66e   : > { %v1612_v30 = vsel %vm1217_vm4, %v4505_v24, 0.0  ;;  %v4509_v31 = vpop.eup %3927 }
 0x66f   : > { %v1606_v32 = vsel %vm1217_vm4, %v4509_v31, 0.0 }
 0x671   : > { %1790 = vrot.lane.b32.xlu1 %v4385_v42, %s4112_s21 }
 0x68c   : > { %1610 = vadd.xlane.f32.xlu0 %v1609_v29 }
 0x695   : > { %1613 = vadd.xlane.f32.xlu1 %v1612_v30 }
 0x699   : > { %1607 = vadd.xlane.f32.xlu1 %v1606_v32 }
 0x6a2   : > { %1860 = vrot.lane.b32.xlu0 %v4397_v58, %s4112_s21 }
 0x6a6   : > { %1788 = vrot.lane.b32.xlu0 %v4390_v46, %s4113_s20 }
 0x6aa   : > { %1786 = vrot.lane.b32.xlu1 %v4385_v42, %s4113_s20  ;;  %1854 = vrot.lane.b32.xlu0 %v4393_v54, %s4113_s20 }
 0x6ae   : > { %1858 = vrot.lane.b32.xlu1 %v4393_v54, %s4112_s21  ;;  %s4974_s21 = scalar_lea.vmem %s4931_s7, %s4254_s25 }
 0x6b2   : > { %1856 = vrot.lane.b32.xlu1 %v4397_v58, %s4113_s20  ;;  %s4976_s20 = sld [smem:[#allocation20_spill]] (!%p3461_p6) }
 0x6d8   : > { %v1599_v33 = vpop.xlane.xlu0 %1598 }
 0x6d9   : > { %3929 = vrcp.f32 %v1599_v33 }
 0x6dc   : > { %v1605_v34 = vpop.xlane.xlu0 %1604 }
 0x6dd   : > { %3931 = vrcp.f32 %v1605_v34  ;;  %v1602_v35 = vpop.xlane.xlu1 %1601 }
 0x6de   : > { %3933 = vrcp.f32 %v1602_v35 }
 0x6e0   : > { %v1634_v36 = vpop.permute.xlu0 %1633 }
 0x6e1   : > { %v1643_v37 = vsel %vm1299_vm5, %v1634_v36, 0  ;;  %v1632_v38 = vpop.permute.xlu1 %1631  ;;  %3800 = vmatprep.subr.msk.bf16.mxu0 %vm1299_vm5, %v1634_v36 }
 0x6e2   : > { %3651 = vmatpush3.bf16.msra.mxu0 %v1643_v37 }
 0x6e3   : > { %3652 = vmatprep.subr.bf16.mxu0 %v1632_v38 }
 0x6e4   : > { %v1694_v47 = vpop.permute.xlu0 %1693 }
 0x6e5   : > { %v1793_v39 = vpop.permute.xlu1 %1792 }
 0x6e6   : > { %3653 = vmatpush3.bf16.msra.mxu0 %v1632_v38  ;;  %v3930_v40 = vpop.eup %3929  ;;  %v1804_v55 = vsel %vm1084_vm3, %v1793_v39, 0 }
 0x6e7   : > { %3802 = vmatprep.subr.msk.bf16.mxu0 %vm1084_vm3, %v1793_v39  ;;  %v1621_v49 = vmul.f32 %v3930_v40, %v4481_v12 }
 0x6e9   : > { %v1696_v41 = vpop.permute.xlu1 %1695 }
 0x6ea   : > { %v3932_v43 = vpop.eup %3931  ;;  %v1705_v44 = vsel %vm1299_vm5, %v1696_v41, 0  ;;  %3801 = vmatprep.subr.msk.bf16.mxu1 %vm1299_vm5, %v1696_v41 }
 0x6eb   : > { %v3934_v45 = vpop.eup %3933  ;;  %3659 = vmatpush3.bf16.msra.mxu1 %v1705_v44  ;;  %v1623_v48 = vmul.f32 %v3932_v43, %v4485_v14 }
 0x6ec   : > { %3660 = vmatprep.subr.bf16.mxu1 %v1694_v47  ;;  %v1622_v51 = vmul.f32 %v3934_v45, %v4487_v15 }
 0x6ed   : > { %v1628_v52 = vpack.c.bf16 %v1623_v48, %v1623_v48  ;;  %v1791_v56 = vpop.permute.xlu1 %1790 }
 0x6ee   : > { %v1627_v53 = vpack.c.bf16 %v1622_v51, %v1621_v49  ;;  %v1801_v57 = vsel %vm1084_vm3, %v1791_v56, 0 }
 0x6ef   : > { %3661 = vmatpush3.bf16.msra.mxu1 %v1694_v47 }
 0x6f0   : > { %3654 = vmatprep.mubr.msk.bf16.mxu0 %vm1217_vm4, %v1627_v53 }
 0x6f1   : > { %3655 = vmatmul.mubr.msk.bf16.vlgmr.msra.gmra.mxu0 %vm1217_vm4, %v1628_v52 }
 0x6f2   : > { %3667 = vmatpush3.bf16.xpose.msra.mxu0 %v1804_v55 }
 0x6f3   : > { %3803 = vmatprep.subr.msk.bf16.mxu0 %vm1084_vm3, %v1791_v56 }
 0x6fa   : > { %3669 = vmatpush3.bf16.xpose.msra.mxu0 %v1801_v57 }
 0x715   : > { %v1611_v59 = vpop.xlane.xlu0 %1610 }
 0x719   : > { %v1861_v60 = vpop.permute.xlu0 %1860 }
 0x71a   : > { %3804 = vmatprep.subr.msk.bf16.mxu1 %vm1084_vm3, %v1861_v60  ;;  %v1872_v9 = vsel %vm1084_vm3, %v1861_v60, 0 }
 0x71d   : > { %v1789_v0 = vpop.permute.xlu0 %1788 }
 0x71e   : > { %v1614_v61 = vpop.xlane.xlu1 %1613 }
 0x71f   : > { %3935 = vrcp.f32 %v1614_v61 }
 0x720   : > { %3937 = vrcp.f32 %v1611_v59 }
 0x721   : > { %v1855_v10 = vpop.permute.xlu0 %1854 }
 0x722   : > { %v1608_v62 = vpop.xlane.xlu1 %1607 }
 0x723   : > { %3939 = vrcp.f32 %v1608_v62 }
 0x726   : > { %v1787_v63 = vpop.permute.xlu1 %1786 }
 0x727   : > { %3670 = vmatprep.mubr.msk.bf16.mxu0 %vm1084_vm3, %v1787_v63 }
 0x728   : > { %3671 = vmatmul.mubr.msk.bf16.vlgmr.msra.gmra.mxu0 %vm1084_vm3, %v1789_v0 }
 0x72a   : > { %v1859_v11 = vpop.permute.xlu1 %1858 }
 0x72b   : > { %v1869_v12 = vsel %vm1084_vm3, %v1859_v11, 0 }
 0x72c   : > { %v3936_v1 = vpop.eup %3935 }
 0x72d   : > { %v3938_v2 = vpop.eup %3937  ;;  %v1626_v4 = vmul.f32 %v3936_v1, %v4505_v24 }
 0x72e   : > { %v1625_v6 = vmul.f32 %v3938_v2, %v4501_v28  ;;  %v1857_v13 = vpop.permute.xlu1 %1856 }
 0x72f   : > { %v1630_v8 = vpack.c.bf16 %v1626_v4, %v1626_v4 }
 0x730   : > { %v3940_v3 = vpop.eup %3939 }
 0x731   : > { %v1624_v5 = vmul.f32 %v3940_v3, %v4509_v31 }
 0x733   : > { %v1629_v7 = vpack.c.bf16 %v1625_v6, %v1624_v5 }
 0x735   : > { %3662 = vmatprep.mubr.msk.bf16.mxu1 %vm1217_vm4, %v1629_v7 }
 0x736   : > { %3663 = vmatmul.mubr.msk.bf16.vlgmr.msra.gmra.mxu1 %vm1217_vm4, %v1630_v8 }
 0x737   : > { %3675 = vmatpush3.bf16.xpose.msra.mxu1 %v1872_v9  ;;  %3678 = vmatprep.mubr.msk.bf16.mxu1 %vm1084_vm3, %v1855_v10 }
 0x738   : > { %3805 = vmatprep.subr.msk.bf16.mxu1 %vm1084_vm3, %v1859_v11 }
 0x73f   : > { %3677 = vmatpush3.bf16.xpose.msra.mxu1 %v1869_v12 }
 0x746   : > { %3679 = vmatmul.mubr.msk.bf16.vlgmr.msra.gmra.mxu1 %vm1084_vm3, %v1857_v13 }
 0x7b1   : > { %v4547_v14 = vpop.f32.mrf.mxu0 }
 0x7b3   : > { %v4549_v15 = vpop.f32.mrf.mxu0 }
 0x7b5   : > { %v3657_v16 = vpop.f32.mrf.mxu0 }
 0x7b7   : > { %v4551_v17 = vpop.f32.mrf.mxu0 }
 0x7e8   : > { %v3672_v18 = vpop.f32.mrf.mxu0 }
 0x7e9   : > { %v1924_v22 = vmul.f32 0.35355338, %v3672_v18 }
 0x7ea   : > { %v1840_v19 = vpop.f32.mrf.mxu0 }
 0x7eb   : > { %v1922_v20 = vmul.f32 0.35355338, %v1840_v19  ;;  %v1934_v27 = vsel %vm1217_vm4, %v1924_v22, -inf }
 0x7ec   : > { %v3673_v21 = vpop.f32.mrf.mxu0 }
 0x7ed   : > { %v1928_v23 = vsel %vm1217_vm4, %v1922_v20, -inf }
 0x7ee   : > { %1929 = vmax.xlane.f32.xlu0 %v1928_v23  ;;  %v1843_v25 = vpop.f32.mrf.mxu0 }
 0x7ef   : > { %v1923_v26 = vmul.f32 0.35355338, %v1843_v25 }
 0x7f1   : > { %v1931_v28 = vsel %vm1217_vm4, %v1923_v26, -inf }
 0x7f2   : > { %1935 = vmax.xlane.f32.xlu0 %v1934_v27  ;;  %1932 = vmax.xlane.f32.xlu1 %v1931_v28 }
 0x7f6   : > { %v4556_v29 = vpop.f32.mrf.mxu1 }
 0x7f8   : > { %v4558_v24 = vpop.f32.mrf.mxu1 }
 0x7fa   : > { %v3665_v30 = vpop.f32.mrf.mxu1 }
 0x7fc   : > { %v4560_v31 = vpop.f32.mrf.mxu1 }
 0x806   : > { %v3680_v32 = vpop.f32.mrf.mxu1 }
 0x807   : > { %v1927_v33 = vmul.f32 0.35355338, %v3680_v32 }
 0x808   : > { %v1908_v34 = vpop.f32.mrf.mxu1 }
 0x809   : > { %v1925_v35 = vmul.f32 0.35355338, %v1908_v34  ;;  %v1943_v36 = vsel %vm1217_vm4, %v1927_v33, -inf }
 0x80a   : > { %1944 = vmax.xlane.f32.xlu1 %v1943_v36  ;;  %v3681_v37 = vpop.f32.mrf.mxu1 }
 0x80b   : > { %v1937_v38 = vsel %vm1217_vm4, %v1925_v35, -inf }
 0x80c   : > { %1938 = vmax.xlane.f32.xlu0 %v1937_v38  ;;  %v1911_v39 = vpop.f32.mrf.mxu1 }
 0x80d   : > { %v1926_v40 = vmul.f32 0.35355338, %v1911_v39 }
 0x80f   : > { %v1940_v41 = vsel %vm1217_vm4, %v1926_v40, -inf }
 0x810   : > { %1941 = vmax.xlane.f32.xlu0 %v1940_v41 }
 0x877   : > { %v1930_v43 = vpop.xlane.xlu0 %1929 }
 0x878   : > { %v1946_v44 = vsub.f32 %v1922_v20, %v1930_v43 }
 0x87a   : > { %v1952_v45 = vmul.f32 1.442695, %v1946_v44 }
 0x87b   : > { %v1936_v47 = vpop.xlane.xlu0 %1935  ;;  %v1933_v48 = vpop.xlane.xlu1 %1932 }
 0x87c   : > { %3941 = vpow2.f32 %v1952_v45  ;;  %v1948_v49 = vsub.f32 %v1924_v22, %v1936_v47  ;;  %v1947_v51 = vsub.f32 %v1923_v26, %v1933_v48 }
 0x87e   : > { %v1956_v52 = vmul.f32 1.442695, %v1948_v49  ;;  %v1954_v53 = vmul.f32 1.442695, %v1947_v51 }
 0x880   : > { %3943 = vpow2.f32 %v1956_v52 }
 0x881   : > { %3945 = vpow2.f32 %v1954_v53 }
 0x889   : > { %v4565_v55 = vpop.eup %3941 }
 0x88a   : > { %v1964_v56 = vsel %vm1217_vm4, %v4565_v55, 0.0 }
 0x88b   : > { %1965 = vadd.xlane.f32.xlu0 %v1964_v56 }
 0x88d   : > { %v4569_v57 = vpop.eup %3943 }
 0x88e   : > { %v4571_v59 = vpop.eup %3945  ;;  %v1970_v60 = vsel %vm1217_vm4, %v4569_v57, 0.0 }
 0x88f   : > { %1971 = vadd.xlane.f32.xlu0 %v1970_v60  ;;  %v1967_v61 = vsel %vm1217_vm4, %v4571_v59, 0.0 }
 0x890   : > { %1968 = vadd.xlane.f32.xlu1 %v1967_v61 }
 0x893   : > { %v1945_v2 = vpop.xlane.xlu1 %1944 }
 0x894   : > { %v1951_v3 = vsub.f32 %v1927_v33, %v1945_v2 }
 0x895   : > { %v1939_v62 = vpop.xlane.xlu0 %1938 }
 0x896   : > { %v1962_v4 = vmul.f32 1.442695, %v1951_v3  ;;  %v1949_v5 = vsub.f32 %v1925_v35, %v1939_v62 }
 0x898   : > { %v1958_v6 = vmul.f32 1.442695, %v1949_v5 }
 0x899   : > { %v1942_v63 = vpop.xlane.xlu0 %1941 }
 0x89a   : > { %v1950_v0 = vsub.f32 %v1926_v40, %v1942_v63 }
 0x89c   : > { %v1960_v1 = vmul.f32 1.442695, %v1950_v0 }
 0x89e   : > { %3947 = vpow2.f32 %v1960_v1 }
 0x89f   : > { %3949 = vpow2.f32 %v1962_v4 }
 0x8a0   : > { %3951 = vpow2.f32 %v1958_v6 }
 0x8a1   : > { %1998 = vrot.lane.b32.xlu1 %v4385_v42, %s4114_s18 }
 0x8a5   : > { %2159 = vrot.lane.b32.xlu1 %v4390_v46, %s4115_s23  ;;  %2000 = vrot.lane.b32.xlu0 %v4390_v46, %s4114_s18 }
 0x8a9   : > { %2062 = vrot.lane.b32.xlu1 %v4397_v58, %s4114_s18  ;;  %2060 = vrot.lane.b32.xlu0 %v4393_v54, %s4114_s18 }
 0x8ab   : > { %v4585_v7 = vpop.eup %3947 }
 0x8ac   : > { %v1976_v8 = vsel %vm1217_vm4, %v4585_v7, 0.0  ;;  %v4589_v9 = vpop.eup %3949 }
 0x8ad   : > { %2157 = vrot.lane.b32.xlu1 %v4385_v42, %s4115_s23  ;;  %v1979_v10 = vsel %vm1217_vm4, %v4589_v9, 0.0  ;;  %v4593_v11 = vpop.eup %3951 }
 0x8ae   : > { %v1973_v12 = vsel %vm1217_vm4, %v4593_v11, 0.0 }
 0x8c8   : > { %1977 = vadd.xlane.f32.xlu0 %v1976_v8 }
 0x8d1   : > { %1980 = vadd.xlane.f32.xlu1 %v1979_v10 }
 0x8d5   : > { %1974 = vadd.xlane.f32.xlu1 %v1973_v12 }
 0x8de   : > { %2227 = vrot.lane.b32.xlu0 %v4397_v58, %s4115_s23 }
 0x8e2   : > { %2155 = vrot.lane.b32.xlu0 %v4390_v46, %s4116_s28 }
 0x8e6   : > { %2153 = vrot.lane.b32.xlu1 %v4385_v42, %s4116_s28  ;;  %2221 = vrot.lane.b32.xlu0 %v4393_v54, %s4116_s28 }
 0x8ea   : > { %2225 = vrot.lane.b32.xlu1 %v4393_v54, %s4115_s23  ;;  %s4977_s23 = sld [smem:[#allocation21_spill]] (!%p3461_p6) }
 0x8ee   : > { %2223 = vrot.lane.b32.xlu1 %v4397_v58, %s4116_s28 }
 0x914   : > { %v1966_v13 = vpop.xlane.xlu0 %1965 }
 0x915   : > { %3953 = vrcp.f32 %v1966_v13 }
 0x918   : > { %v1972_v16 = vpop.xlane.xlu0 %1971 }
 0x919   : > { %3955 = vrcp.f32 %v1972_v16  ;;  %v1969_v18 = vpop.xlane.xlu1 %1968 }
 0x91a   : > { %3957 = vrcp.f32 %v1969_v18 }
 0x91c   : > { %v2001_v19 = vpop.permute.xlu0 %2000 }
 0x91d   : > { %v2010_v20 = vsel %vm1299_vm5, %v2001_v19, 0  ;;  %v1999_v21 = vpop.permute.xlu1 %1998  ;;  %3806 = vmatprep.subr.msk.bf16.mxu0 %vm1299_vm5, %v2001_v19 }
 0x91e   : > { %3683 = vmatpush3.bf16.msra.mxu0 %v2010_v20 }
 0x91f   : > { %3684 = vmatprep.subr.bf16.mxu0 %v1999_v21 }
 0x920   : > { %v2061_v30 = vpop.permute.xlu0 %2060 }
 0x921   : > { %v2160_v22 = vpop.permute.xlu1 %2159 }
 0x922   : > { %3685 = vmatpush3.bf16.msra.mxu0 %v1999_v21  ;;  %v3954_v23 = vpop.eup %3953  ;;  %v2171_v37 = vsel %vm1084_vm3, %v2160_v22, 0 }
 0x923   : > { %3808 = vmatprep.subr.msk.bf16.mxu0 %vm1084_vm3, %v2160_v22  ;;  %v1988_v33 = vmul.f32 %v3954_v23, %v4565_v55 }
 0x925   : > { %v2063_v25 = vpop.permute.xlu1 %2062 }
 0x926   : > { %v3956_v26 = vpop.eup %3955  ;;  %v2072_v27 = vsel %vm1299_vm5, %v2063_v25, 0  ;;  %3807 = vmatprep.subr.msk.bf16.mxu1 %vm1299_vm5, %v2063_v25 }
 0x927   : > { %v3958_v28 = vpop.eup %3957  ;;  %3691 = vmatpush3.bf16.msra.mxu1 %v2072_v27  ;;  %v1990_v32 = vmul.f32 %v3956_v26, %v4569_v57 }
 0x928   : > { %3692 = vmatprep.subr.bf16.mxu1 %v2061_v30  ;;  %v1989_v34 = vmul.f32 %v3958_v28, %v4571_v59 }
 0x929   : > { %v1995_v35 = vpack.c.bf16 %v1990_v32, %v1990_v32  ;;  %v2158_v38 = vpop.permute.xlu1 %2157 }
 0x92a   : > { %v1994_v36 = vpack.c.bf16 %v1989_v34, %v1988_v33  ;;  %v2168_v39 = vsel %vm1084_vm3, %v2158_v38, 0 }
 0x92b   : > { %3693 = vmatpush3.bf16.msra.mxu1 %v2061_v30 }
 0x92c   : > { %3686 = vmatprep.mubr.msk.bf16.mxu0 %vm1217_vm4, %v1994_v36 }
 0x92d   : > { %3687 = vmatmul.mubr.msk.bf16.vlgmr.msra.gmra.mxu0 %vm1217_vm4, %v1995_v35 }
 0x92e   : > { %3699 = vmatpush3.bf16.xpose.msra.mxu0 %v2171_v37 }
 0x92f   : > { %3809 = vmatprep.subr.msk.bf16.mxu0 %vm1084_vm3, %v2158_v38 }
 0x936   : > { %3701 = vmatpush3.bf16.xpose.msra.mxu0 %v2168_v39 }
 0x951   : > { %v1978_v40 = vpop.xlane.xlu0 %1977 }
 0x955   : > { %v2228_v41 = vpop.permute.xlu0 %2227 }
 0x956   : > { %3810 = vmatprep.subr.msk.bf16.mxu1 %vm1084_vm3, %v2228_v41  ;;  %v2239_v59 = vsel %vm1084_vm3, %v2228_v41, 0 }
 0x959   : > { %v2156_v47 = vpop.permute.xlu0 %2155 }
 0x95a   : > { %v1981_v43 = vpop.xlane.xlu1 %1980 }
 0x95b   : > { %3959 = vrcp.f32 %v1981_v43 }
 0x95c   : > { %3961 = vrcp.f32 %v1978_v40 }
 0x95d   : > { %v2222_v60 = vpop.permute.xlu0 %2221 }
 0x95e   : > { %v1975_v44 = vpop.xlane.xlu1 %1974 }
 0x95f   : > { %3963 = vrcp.f32 %v1975_v44 }
 0x962   : > { %v2154_v45 = vpop.permute.xlu1 %2153 }
 0x963   : > { %3702 = vmatprep.mubr.msk.bf16.mxu0 %vm1084_vm3, %v2154_v45 }
 0x964   : > { %3703 = vmatmul.mubr.msk.bf16.vlgmr.msra.gmra.mxu0 %vm1084_vm3, %v2156_v47 }
 0x966   : > { %v2226_v61 = vpop.permute.xlu1 %2225 }
 0x967   : > { %v2236_v62 = vsel %vm1084_vm3, %v2226_v61, 0 }
 0x968   : > { %v3960_v48 = vpop.eup %3959 }
 0x969   : > { %v3962_v49 = vpop.eup %3961  ;;  %v1993_v52 = vmul.f32 %v3960_v48, %v4589_v9 }
 0x96a   : > { %v1992_v55 = vmul.f32 %v3962_v49, %v4585_v7  ;;  %v2224_v63 = vpop.permute.xlu1 %2223 }
 0x96b   : > { %v1997_v57 = vpack.c.bf16 %v1993_v52, %v1993_v52 }
 0x96c   : > { %v3964_v51 = vpop.eup %3963 }
 0x96d   : > { %v1991_v53 = vmul.f32 %v3964_v51, %v4593_v11 }
 0x96f   : > { %v1996_v56 = vpack.c.bf16 %v1992_v55, %v1991_v53 }
 0x971   : > { %3694 = vmatprep.mubr.msk.bf16.mxu1 %vm1217_vm4, %v1996_v56 }
 0x972   : > { %3695 = vmatmul.mubr.msk.bf16.vlgmr.msra.gmra.mxu1 %vm1217_vm4, %v1997_v57 }
 0x973   : > { %3707 = vmatpush3.bf16.xpose.msra.mxu1 %v2239_v59  ;;  %3710 = vmatprep.mubr.msk.bf16.mxu1 %vm1084_vm3, %v2222_v60 }
 0x974   : > { %3811 = vmatprep.subr.msk.bf16.mxu1 %vm1084_vm3, %v2226_v61 }
 0x97b   : > { %3709 = vmatpush3.bf16.xpose.msra.mxu1 %v2236_v62 }
 0x982   : > { %3711 = vmatmul.mubr.msk.bf16.vlgmr.msra.gmra.mxu1 %vm1084_vm3, %v2224_v63 }
 0x9ed   : > { %v4631_v0 = vpop.f32.mrf.mxu0 }
 0x9ef   : > { %v4633_v1 = vpop.f32.mrf.mxu0 }
 0x9f1   : > { %v3689_v2 = vpop.f32.mrf.mxu0 }
 0x9f3   : > { %v4635_v3 = vpop.f32.mrf.mxu0 }
 0xa24   : > { %v3704_v4 = vpop.f32.mrf.mxu0 }
 0xa25   : > { %v2291_v8 = vmul.f32 0.35355338, %v3704_v4 }
 0xa26   : > { %v2207_v5 = vpop.f32.mrf.mxu0 }
 0xa27   : > { %v2289_v6 = vmul.f32 0.35355338, %v2207_v5  ;;  %v2301_v12 = vsel %vm1217_vm4, %v2291_v8, -inf }
 0xa28   : > { %v3705_v7 = vpop.f32.mrf.mxu0 }
 0xa29   : > { %v2295_v9 = vsel %vm1217_vm4, %v2289_v6, -inf }
 0xa2a   : > { %2296 = vmax.xlane.f32.xlu0 %v2295_v9  ;;  %v2210_v10 = vpop.f32.mrf.mxu0 }
 0xa2b   : > { %v2290_v11 = vmul.f32 0.35355338, %v2210_v10 }
 0xa2d   : > { %v2298_v13 = vsel %vm1217_vm4, %v2290_v11, -inf }
 0xa2e   : > { %2302 = vmax.xlane.f32.xlu0 %v2301_v12  ;;  %2299 = vmax.xlane.f32.xlu1 %v2298_v13 }
 0xa32   : > { %v4640_v16 = vpop.f32.mrf.mxu1 }
 0xa34   : > { %v4642_v18 = vpop.f32.mrf.mxu1 }
 0xa36   : > { %v3697_v19 = vpop.f32.mrf.mxu1 }
 0xa38   : > { %v4644_v20 = vpop.f32.mrf.mxu1 }
 0xa42   : > { %v3712_v21 = vpop.f32.mrf.mxu1 }
 0xa43   : > { %v2294_v22 = vmul.f32 0.35355338, %v3712_v21 }
 0xa44   : > { %v2275_v23 = vpop.f32.mrf.mxu1 }
 0xa45   : > { %v2292_v25 = vmul.f32 0.35355338, %v2275_v23  ;;  %v2310_v26 = vsel %vm1217_vm4, %v2294_v22, -inf }
 0xa46   : > { %2311 = vmax.xlane.f32.xlu1 %v2310_v26  ;;  %v3713_v27 = vpop.f32.mrf.mxu1 }
 0xa47   : > { %v2304_v28 = vsel %vm1217_vm4, %v2292_v25, -inf }
 0xa48   : > { %2305 = vmax.xlane.f32.xlu0 %v2304_v28  ;;  %v2278_v30 = vpop.f32.mrf.mxu1 }
 0xa49   : > { %v2293_v32 = vmul.f32 0.35355338, %v2278_v30 }
 0xa4b   : > { %v2307_v33 = vsel %vm1217_vm4, %v2293_v32, -inf }
 0xa4c   : > { %2308 = vmax.xlane.f32.xlu0 %v2307_v33 }
 0xab3   : > { %v2297_v34 = vpop.xlane.xlu0 %2296 }
 0xab4   : > { %v2313_v35 = vsub.f32 %v2289_v6, %v2297_v34 }
 0xab6   : > { %v2319_v36 = vmul.f32 1.442695, %v2313_v35 }
 0xab7   : > { %v2303_v37 = vpop.xlane.xlu0 %2302  ;;  %v2300_v38 = vpop.xlane.xlu1 %2299 }
 0xab8   : > { %3965 = vpow2.f32 %v2319_v36  ;;  %v2315_v39 = vsub.f32 %v2291_v8, %v2303_v37  ;;  %v2314_v40 = vsub.f32 %v2290_v11, %v2300_v38 }
 0xaba   : > { %v2323_v41 = vmul.f32 1.442695, %v2315_v39  ;;  %v2321_v43 = vmul.f32 1.442695, %v2314_v40 }
 0xabc   : > { %3967 = vpow2.f32 %v2323_v41  ;;  %v3873_v41 = vld [vmem:[%s4277_s17 + $0x8] sm:$0xff]  }
 0xabd   : > { %3969 = vpow2.f32 %v2321_v43  ;;  %v3874_v43 = vld [vmem:[%s4277_s17] sm:$0xff]   ;;  %s4975_s17 = sld [smem:[#allocation19_spill]] (!%p3461_p6) }
 0xac5   : > { %v3966_v44 = vpop.eup %3965 }
 0xac6   : > { %v2331_v45 = vsel %vm1217_vm4, %v3966_v44, 0.0 }
 0xac7   : > { %2332 = vadd.xlane.f32.xlu0 %v2331_v45 }
 0xac9   : > { %v4650_v47 = vpop.eup %3967 }
 0xaca   : > { %v3970_v48 = vpop.eup %3969  ;;  %v2337_v49 = vsel %vm1217_vm4, %v4650_v47, 0.0 }
 0xacb   : > { %2338 = vadd.xlane.f32.xlu0 %v2337_v49  ;;  %v2334_v51 = vsel %vm1217_vm4, %v3970_v48, 0.0 }
 0xacc   : > { %2335 = vadd.xlane.f32.xlu1 %v2334_v51 }
 0xacf   : > { %v2312_v52 = vpop.xlane.xlu1 %2311 }
 0xad0   : > { %v2318_v53 = vsub.f32 %v2294_v22, %v2312_v52 }
 0xad1   : > { %v2306_v55 = vpop.xlane.xlu0 %2305 }
 0xad2   : > { %v2329_v56 = vmul.f32 1.442695, %v2318_v53  ;;  %v2316_v57 = vsub.f32 %v2292_v25, %v2306_v55 }
 0xad4   : > { %3971 = vpow2.f32 %v2329_v56  ;;  %v2325_v59 = vmul.f32 1.442695, %v2316_v57 }
 0xad5   : > { %v2309_v60 = vpop.xlane.xlu0 %2308 }
 0xad6   : > { %3973 = vpow2.f32 %v2325_v59  ;;  %v2317_v61 = vsub.f32 %v2293_v32, %v2309_v60 }
 0xad8   : > { %v2327_v62 = vmul.f32 1.442695, %v2317_v61 }
 0xada   : > { %3975 = vpow2.f32 %v2327_v62 }
 0xae1   : > { %v4655_v63 = vpop.eup %3971 }
 0xae2   : > { %v2346_v2 = vsel %vm1217_vm4, %v4655_v63, 0.0 }
 0xae3   : > { %v4659_v4 = vpop.eup %3973  ;;  %2347 = vadd.xlane.f32.xlu1 %v2346_v2 }
 0xae4   : > { %v2340_v5 = vsel %vm1217_vm4, %v4659_v4, 0.0 }
 0xae7   : > { %v4663_v6 = vpop.eup %3975  ;;  %2341 = vadd.xlane.f32.xlu1 %v2340_v5 }
 0xae8   : > { %v2343_v7 = vsel %vm1217_vm4, %v4663_v6, 0.0 }
 0xae9   : > { %2344 = vadd.xlane.f32.xlu0 %v2343_v7 }
 0xaf8   : > { %2365 = vrot.lane.b32.xlu1 %v4385_v42, %s4117_s15 }
 0xafc   : > { %2429 = vrot.lane.b32.xlu1 %v4397_v58, %s4117_s15 }
 0xaff   : > { %2367 = vrot.lane.b32.xlu0 %v4390_v46, %s4117_s15 }
 0xb00   : > { %2427 = vrot.lane.b32.xlu1 %v4393_v54, %s4117_s15 }
 0xb03   : > { %1761 = vrot.lane.b32.xlu0 %v4549_v15, %s4118_s19 }
 0xb04   : > { %1763 = vrot.lane.b32.xlu1 %v4551_v17, %s4118_s19 }
 0xb07   : > { %2128 = vrot.lane.b32.xlu0 %v4633_v1, %s4119_s29 }
 0xb08   : > { %2130 = vrot.lane.b32.xlu1 %v4635_v3, %s4119_s29 }
 0xb50   : > { %v2333_v42 = vpop.xlane.xlu0 %2332 }
 0xb51   : > { %3977 = vrcp.f32 %v2333_v42 }
 0xb54   : > { %v2339_v10 = vpop.xlane.xlu0 %2338 }
 0xb55   : > { %v2336_v58 = vpop.xlane.xlu1 %2335 }
 0xb56   : > { %3979 = vrcp.f32 %v2336_v58 }
 0xb57   : > { %3981 = vrcp.f32 %v2339_v10  ;;  %v4013_v10 = vld [vmem:[#allocation2] sm:$0xff] }
 0xb5e   : > { %v3978_v46 = vpop.eup %3977 }
 0xb5f   : > { %v2355_v8 = vmul.f32 %v3978_v46, %v3966_v44  ;;  %v3439_v46 = vld [vmem:[%s4974_s21] ss:$0 sm:$0xff] }
 0xb63   : > { %v3980_v54 = vpop.eup %3979 }
 0xb64   : > { %v2356_v9 = vmul.f32 %v3980_v54, %v3970_v48  ;;  %v3982_v12 = vpop.eup %3981 }
 0xb65   : > { %v2357_v23 = vmul.f32 %v3982_v12, %v4650_v47  ;;  %v4014_v12 = vld [vmem:[#allocation2 + $0x8] sm:$0xff] }
 0xb66   : > { %v2361_v15 = vpack.c.bf16 %v2356_v9, %v2355_v8 }
 0xb67   : > { %v2362_v28 = vpack.c.bf16 %v2357_v23, %v2357_v23 }
 0xb68   : > { %3718 = vmatprep.mubr.msk.bf16.mxu0 %vm1217_vm4, %v2361_v15 }
 0xb6c   : > { %v2348_v17 = vpop.xlane.xlu1 %2347 }
 0xb6d   : > { %3983 = vrcp.f32 %v2348_v17 }
 0xb70   : > { %v2342_v11 = vpop.xlane.xlu1 %2341 }
 0xb71   : > { %3985 = vrcp.f32 %v2342_v11 }
 0xb72   : > { %v2345_v1 = vpop.xlane.xlu0 %2344 }
 0xb73   : > { %3987 = vrcp.f32 %v2345_v1 }
 0xb74   : > { %v2366_v3 = vpop.permute.xlu1 %2365 }
 0xb76   : > { %v2368_v13 = vpop.permute.xlu0 %2367 }
 0xb77   : > { %v2377_v19 = vsel %vm1299_vm5, %v2368_v13, 0  ;;  %3812 = vmatprep.subr.msk.bf16.mxu0 %vm1299_vm5, %v2368_v13 }
 0xb78   : > { %3715 = vmatpush3.bf16.msra.mxu0 %v2377_v19  ;;  %v2430_v21 = vpop.permute.xlu1 %2429 }
 0xb79   : > { %v2439_v22 = vsel %vm1299_vm5, %v2430_v21, 0  ;;  %3716 = vmatprep.subr.bf16.mxu0 %v2366_v3  ;;  %3813 = vmatprep.subr.msk.bf16.mxu1 %vm1299_vm5, %v2430_v21 }
 0xb7a   : > { %v1762_v25 = vpop.permute.xlu0 %1761  ;;  %3723 = vmatpush3.bf16.msra.mxu1 %v2439_v22  ;;  %v3984_v27 = vpop.eup %3983 }
 0xb7b   : > { %1780 = vst.msk [vmem:[#allocation3] sm:$0xff] %vm1779_vm6, %v1762_v25  ;;  %v2360_v35 = vmul.f32 %v3984_v27, %v4655_v63  ;;  %v4015_v25 = vld [vmem:[#allocation2 + $0x10] sm:$0xff] }
 0xb7c   : > { %3717 = vmatpush3.bf16.msra.mxu0 %v2366_v3  ;;  %v2428_v26 = vpop.permute.xlu1 %2427 }
 0xb7d   : > { %3724 = vmatprep.subr.bf16.mxu1 %v2428_v26  ;;  %3730 = vmatprep.subr.bf16.mxu0 %v4105_v50  ;;  %v2364_v40 = vpack.c.bf16 %v2360_v35, %v2360_v35 }
 0xb7e   : > { %v3986_v30 = vpop.eup %3985  ;;  %v2129_v32 = vpop.permute.xlu0 %2128  ;;  %3725 = vmatpush3.bf16.msra.mxu1 %v2428_v26 }
 0xb7f   : > { %2147 = vst.msk [vmem:[#allocation3] sm:$0xff] %vm2146_vm7, %v2129_v32  ;;  %3719 = vmatmul.mubr.msk.bf16.vlgmr.msra.gmra.mxu0 %vm1217_vm4, %v2362_v28  ;;  %3746 = vmatprep.subr.bf16.mxu1 %v4105_v50  ;;  %v2358_v36 = vmul.f32 %v3986_v30, %v4659_v4 }
 0xb80   : > { %v3988_v33 = vpop.eup %3987  ;;  %v1764_v34 = vpop.permute.xlu1 %1763  ;;  %3734 = vmatprep.mubr.msk.bf16.mxu0 %vm4106_vm2, %v4105_v50  ;;  %3731 = vmatpush3.bf16.msra.mxu0 %v3873_v41 }
 0xb81   : > { %1781 = vst.msk [vmem:[#allocation3 + $0x8] sm:$0xff] %vm1779_vm6, %v1764_v34  ;;  %v2359_v37 = vmul.f32 %v3988_v33, %v4663_v6  ;;  %3732 = vmatprep.subr.bf16.mxu0 %v4105_v50  ;;  %v4016_v33 = vld [vmem:[#allocation2 + $0x18] sm:$0xff] }
 0xb83   : > { %v2363_v38 = vpack.c.bf16 %v2359_v37, %v2358_v36 }
 0xb84   : > { %v2131_v39 = vpop.permute.xlu1 %2130  ;;  %3733 = vmatpush3.bf16.msra.mxu0 %v3874_v43 }
 0xb85   : > { %2148 = vst.msk [vmem:[#allocation3 + $0x8] sm:$0xff] %vm2146_vm7, %v2131_v39  ;;  %3726 = vmatprep.mubr.msk.bf16.mxu1 %vm1217_vm4, %v2363_v38  ;;  %3762 = vmatprep.subr.bf16.mxu0 %v4105_v50  ;;  %v4017_v39 = vld [vmem:[#allocation2 + $0x20] sm:$0xff] }
 0xb86   : > { %3727 = vmatmul.mubr.msk.bf16.vlgmr.msra.gmra.mxu1 %vm1217_vm4, %v2364_v40 }
 0xb87   : > { %3750 = vmatprep.mubr.msk.bf16.mxu1 %vm4106_vm2, %v4105_v50 }
 0xc3f   : > { %v3720_v44 = vpop.f32.mrf.mxu0 }
 0xc41   : > { %v2413_v45 = vpop.f32.mrf.mxu0 }
 0xc42   : > { %2495 = vrot.lane.b32.xlu0 %v2413_v45, %s4120_s30 }
 0xc43   : > { %v3721_v47 = vpop.f32.mrf.mxu0 }
 0xc44   : > { %v4018_v47 = vld [vmem:[#allocation2 + $0x28] sm:$0xff] }
 0xc45   : > { %v2416_v48 = vpop.f32.mrf.mxu0 }
 0xc46   : > { %1765 = vrot.lane.b32.xlu0 %v4547_v14, %s4118_s19  ;;  %2497 = vrot.lane.b32.xlu1 %v2416_v48, %s4120_s30  ;;  %v3728_v49 = vpop.f32.mrf.mxu1 }
 0xc48   : > { %v2475_v51 = vpop.f32.mrf.mxu1 }
 0xc4a   : > { %2132 = vrot.lane.b32.xlu0 %v4631_v0, %s4119_s29  ;;  %1767 = vrot.lane.b32.xlu1 %v4558_v24, %s4118_s19  ;;  %v3729_v52 = vpop.f32.mrf.mxu1 }
 0xc4c   : > { %v2478_v14 = vpop.f32.mrf.mxu1 }
 0xc4e   : > { %2499 = vrot.lane.b32.xlu0 %v3720_v44, %s4120_s30  ;;  %2134 = vrot.lane.b32.xlu1 %v4642_v18, %s4119_s29 }
 0xc52   : > { %1769 = vrot.lane.b32.xlu0 %v4560_v31, %s4118_s19  ;;  %1771 = vrot.lane.b32.xlu1 %v4556_v29, %s4118_s19 }
 0xc56   : > { %2136 = vrot.lane.b32.xlu0 %v4644_v20, %s4119_s29  ;;  %2501 = vrot.lane.b32.xlu1 %v2475_v51, %s4120_s30 }
 0xc5a   : > { %2138 = vrot.lane.b32.xlu1 %v4640_v16, %s4119_s29  ;;  %2503 = vrot.lane.b32.xlu0 %v2478_v14, %s4120_s30 }
 0xc5e   : > { %2505 = vrot.lane.b32.xlu1 %v3728_v49, %s4120_s30 }
 0xcb4   : > { %v2496_v24 = vpop.permute.xlu0 %2495 }
 0xcb5   : > { %2514 = vst.msk [vmem:[#allocation3] sm:$0xff] %vm2513_vm8, %v2496_v24 }
 0xcb8   : > { %v1766_v0 = vpop.permute.xlu0 %1765  ;;  %v2498_v18 = vpop.permute.xlu1 %2497 }
 0xcb9   : > { %1782 = vst.msk [vmem:[#allocation3 + $0x10] sm:$0xff] %vm1779_vm6, %v1766_v0 }
 0xcba   : > { %2515 = vst.msk [vmem:[#allocation3 + $0x8] sm:$0xff] %vm2513_vm8, %v2498_v18 }
 0xcbc   : > { %v2133_v29 = vpop.permute.xlu0 %2132  ;;  %v1768_v31 = vpop.permute.xlu1 %1767  ;;  %v2520_v53 = vld [vmem:[#allocation3] sm:$0xff] }
 0xcbd   : > { %2149 = vst.msk [vmem:[#allocation3 + $0x10] sm:$0xff] %vm2146_vm7, %v2133_v29 }
 0xcbe   : > { %1783 = vst.msk [vmem:[#allocation3 + $0x18] sm:$0xff] %vm1779_vm6, %v1768_v31 }
 0xcc0   : > { %v2500_v20 = vpop.permute.xlu0 %2499  ;;  %v2135_v16 = vpop.permute.xlu1 %2134 }
 0xcc1   : > { %v2521_v55 = vld [vmem:[#allocation3 + $0x8] sm:$0xff]  ;;  %2516 = vst.msk [vmem:[#allocation3 + $0x10] sm:$0xff] %vm2513_vm8, %v2500_v20 }
 0xcc2   : > { %2150 = vst.msk [vmem:[#allocation3 + $0x18] sm:$0xff] %vm2146_vm7, %v2135_v16  ;;  %v2526_v56 = vpack.c.bf16 %v2521_v55, %v2520_v53 }
 0xcc4   : > { %3735 = vmatmul.mubr.msk.bf16.vlgmr.msra.gmra.mxu0 %vm878_vm1, %v2526_v56  ;;  %v1770_v57 = vpop.permute.xlu0 %1769  ;;  %v1772_v59 = vpop.permute.xlu1 %1771 }
 0xcc5   : > { %3738 = vmatprep.mubr.msk.bf16.mxu0 %vm4106_vm2, %v4105_v50  ;;  %1784 = vst.msk [vmem:[#allocation3 + $0x20] sm:$0xff] %vm1779_vm6, %v1770_v57  ;;  %1785 = vst.msk [vmem:[#allocation3 + $0x28] sm:$0xff] %vm1779_vm6, %v1772_v59 }
 0xcc8   : > { %v2137_v60 = vpop.permute.xlu0 %2136  ;;  %v2502_v61 = vpop.permute.xlu1 %2501  ;;  %v2522_v4 = vld [vmem:[#allocation3 + $0x10] sm:$0xff] }
 0xcc9   : > { %2151 = vst.msk [vmem:[#allocation3 + $0x20] sm:$0xff] %vm2146_vm7, %v2137_v60 }
 0xcca   : > { %2517 = vst.msk [vmem:[#allocation3 + $0x18] sm:$0xff] %vm2513_vm8, %v2502_v61 }
 0xccc   : > { %v2504_v62 = vpop.permute.xlu0 %2503  ;;  %v2139_v63 = vpop.permute.xlu1 %2138 }
 0xccd   : > { %2518 = vst.msk [vmem:[#allocation3 + $0x20] sm:$0xff] %vm2513_vm8, %v2504_v62 }
 0xcce   : > { %2152 = vst.msk [vmem:[#allocation3 + $0x28] sm:$0xff] %vm2146_vm7, %v2139_v63 }
 0xcd0   : > { %v2506_v2 = vpop.permute.xlu1 %2505 }
 0xcd1   : > { %v2523_v5 = vld [vmem:[#allocation3 + $0x18] sm:$0xff]  ;;  %2519 = vst.msk [vmem:[#allocation3 + $0x28] sm:$0xff] %vm2513_vm8, %v2506_v2 }
 0xcd2   : > { %v2527_v6 = vpack.c.bf16 %v2523_v5, %v2522_v4 }
 0xcd4   : > { %3739 = vmatmul.mubr.msk.bf16.gmra.mxu0 %vm878_vm1, %v2527_v6  ;;  %v2524_v7 = vld [vmem:[#allocation3 + $0x20] sm:$0xff] }
 0xcd5   : > { %3742 = vmatprep.mubr.msk.bf16.mxu0 %vm4106_vm2, %v4105_v50 }
 0xcd8   : > { %v2525_v42 = vld [vmem:[#allocation3 + $0x28] sm:$0xff] }
 0xcd9   : > { %v2528_v58 = vpack.c.bf16 %v2525_v42, %v2524_v7 }
 0xcdc   : > { %3743 = vmatmul.mubr.msk.bf16.gmra.mxu0 %vm878_vm1, %v2528_v58 }
 0xcdd   : > { %3770 = vmatprep.mubr.msk.bf16.mxu0 %vm4106_vm2, %v4105_v50 }
 0xd84   : > { %v2595_v54 = vpop.f32.mrf.mxu0 }
 0xd85   : > { %v2596_v8 = vadd.f32 %v3439_v46, %v2595_v54 }
 0xd86   : > { %v3736_v9 = vpop.f32.mrf.mxu0 }
 0xd87   : > { %v4749_v15 = vadd.f32 %v4013_v10, %v2596_v8  ;;  %v3875_v10 = vld [vmem:[%s4294_s26 + $0x8] sm:$0xff]  }
 0xd88   : > { %v2598_v17 = vpop.f32.mrf.mxu0  ;;  %3747 = vmatpush3.bf16.msra.mxu1 %v3875_v10 }
 0xd89   : > { %v2599_v11 = vadd.f32 %v3439_v46, %v2598_v17  ;;  %v2626_v1 = vsel %vm878_vm1, %v4749_v15, 0.0  ;;  %3748 = vmatprep.subr.bf16.mxu1 %v4105_v50  ;;  %v3876_v17 = vld [vmem:[%s4294_s26] sm:$0xff]  }
 0xd8a   : > { %2627 = vadd.xlane.f32.xlu0 %v2626_v1  ;;  %v3737_v3 = vpop.f32.mrf.mxu0 }
 0xd8b   : > { %v4753_v13 = vadd.f32 %v4014_v12, %v2599_v11 }
 0xd8c   : > { %3749 = vmatpush3.bf16.msra.mxu1 %v3876_v17 }
 0xd8d   : > { %v2629_v19 = vsel %vm878_vm1, %v4753_v13, 0.0 }
 0xd8e   : > { %2630 = vadd.xlane.f32.xlu1 %v2629_v19 }
 0xd94   : > { %v2603_v21 = vpop.f32.mrf.mxu0 }
 0xd95   : > { %v2604_v22 = vadd.f32 %v3439_v46, %v2603_v21 }
 0xd96   : > { %v3740_v23 = vpop.f32.mrf.mxu0 }
 0xd97   : > { %v4757_v26 = vadd.f32 %v4015_v25, %v2604_v22 }
 0xd98   : > { %v2606_v27 = vpop.f32.mrf.mxu0 }
 0xd99   : > { %v2607_v28 = vadd.f32 %v3439_v46, %v2606_v27  ;;  %v2632_v30 = vsel %vm878_vm1, %v4757_v26, 0.0 }
 0xd9a   : > { %2633 = vadd.xlane.f32.xlu0 %v2632_v30  ;;  %v3741_v32 = vpop.f32.mrf.mxu0 }
 0xd9b   : > { %v4761_v34 = vadd.f32 %v4016_v33, %v2607_v28  ;;  %v3445_v32 = vld [vmem:[%s821_s0] ss:$0 sm:$0xff]  ;;  %s4978_s0 = smov (!%p3461_p6), %s4977_s23 }
 0xd9c   : > { %v2611_v35 = vpop.f32.mrf.mxu0 }
 0xd9d   : > { %v2612_v36 = vadd.f32 %v3439_v46, %v2611_v35  ;;  %v2635_v37 = vsel %vm878_vm1, %v4761_v34, 0.0 }
 0xd9e   : > { %2636 = vadd.xlane.f32.xlu0 %v2635_v37  ;;  %v3744_v38 = vpop.f32.mrf.mxu0 }
 0xd9f   : > { %v4765_v40 = vadd.f32 %v4017_v39, %v2612_v36 }
 0xda0   : > { %v2614_v41 = vpop.f32.mrf.mxu0 }
 0xda1   : > { %v2615_v43 = vadd.f32 %v3439_v46, %v2614_v41  ;;  %v2638_v44 = vsel %vm878_vm1, %v4765_v40, 0.0  ;;  %v3446_v41 = vld [vmem:[%s824_s22] ss:$0 sm:$0xff] }
 0xda2   : > { %2639 = vadd.xlane.f32.xlu0 %v2638_v44  ;;  %v3745_v45 = vpop.f32.mrf.mxu0 }
 0xda3   : > { %v4769_v48 = vadd.f32 %v4018_v47, %v2615_v43 }
 0xda5   : > { %v2641_v49 = vsel %vm878_vm1, %v4769_v48, 0.0 }
 0xda6   : > { %2642 = vadd.xlane.f32.xlu1 %v2641_v49 }
 0xe13   : > { %v2628_v51 = vpop.xlane.xlu0 %2627 }
 0xe14   : > { %v2644_v52 = vmul.f32 0.03125, %v2628_v51 }
 0xe16   : > { %v2650_v14 = vsub.f32 %v4749_v15, %v2644_v52 }
 0xe17   : > { %v2631_v24 = vpop.xlane.xlu1 %2630 }
 0xe18   : > { %v2645_v0 = vmul.f32 0.03125, %v2631_v24  ;;  %v2656_v18 = vmul.f32 %v2650_v14, %v2650_v14 }
 0xe1a   : > { %v2651_v29 = vsub.f32 %v4753_v13, %v2645_v0  ;;  %v2662_v31 = vsel %vm878_vm1, %v2656_v18, 0.0 }
 0xe1b   : > { %2663 = vadd.xlane.f32.xlu0 %v2662_v31 }
 0xe1c   : > { %v2657_v20 = vmul.f32 %v2651_v29, %v2651_v29 }
 0xe1e   : > { %v2665_v16 = vsel %vm878_vm1, %v2657_v20, 0.0 }
 0xe1f   : > { %2666 = vadd.xlane.f32.xlu1 %v2665_v16 }
 0xe23   : > { %v2634_v53 = vpop.xlane.xlu0 %2633 }
 0xe24   : > { %v2646_v55 = vmul.f32 0.03125, %v2634_v53 }
 0xe26   : > { %v4778_v56 = vsub.f32 %v4757_v26, %v2646_v55 }
 0xe27   : > { %v2637_v57 = vpop.xlane.xlu0 %2636 }
 0xe28   : > { %v2647_v59 = vmul.f32 0.03125, %v2637_v57  ;;  %v2658_v60 = vmul.f32 %v4778_v56, %v4778_v56 }
 0xe2a   : > { %v4783_v61 = vsub.f32 %v4761_v34, %v2647_v59  ;;  %v2668_v62 = vsel %vm878_vm1, %v2658_v60, 0.0 }
 0xe2b   : > { %2669 = vadd.xlane.f32.xlu0 %v2668_v62  ;;  %v2640_v63 = vpop.xlane.xlu0 %2639 }
 0xe2c   : > { %v2648_v2 = vmul.f32 0.03125, %v2640_v63  ;;  %v2659_v4 = vmul.f32 %v4783_v61, %v4783_v61 }
 0xe2e   : > { %v4789_v5 = vsub.f32 %v4765_v40, %v2648_v2  ;;  %v2671_v6 = vsel %vm878_vm1, %v2659_v4, 0.0 }
 0xe2f   : > { %2672 = vadd.xlane.f32.xlu1 %v2671_v6  ;;  %v2643_v7 = vpop.xlane.xlu1 %2642 }
 0xe30   : > { %v2649_v42 = vmul.f32 0.03125, %v2643_v7  ;;  %v2660_v58 = vmul.f32 %v4789_v5, %v4789_v5  ;;  %v3877_v7 = vld [vmem:[%s4304_s4 + $0x18] sm:$0xff]  }
 0xe31   : > { %3763 = vmatpush3.bf16.msra.mxu0 %v3877_v7 }
 0xe32   : > { %v2655_v46 = vsub.f32 %v4769_v48, %v2649_v42  ;;  %v2674_v54 = vsel %vm878_vm1, %v2660_v58, 0.0  ;;  %3764 = vmatprep.subr.bf16.mxu0 %v4105_v50  ;;  %v3879_v42 = vld [vmem:[%s4304_s4 + $0x8] sm:$0xff]   ;;  %v3880_v58 = vld [vmem:[%s4304_s4] sm:$0xff]  }
 0xe33   : > { %2675 = vadd.xlane.f32.xlu0 %v2674_v54 }
 0xe34   : > { %v2661_v8 = vmul.f32 %v2655_v46, %v2655_v46 }
 0xe36   : > { %v2677_v9 = vsel %vm878_vm1, %v2661_v8, 0.0 }
 0xe37   : > { %2678 = vadd.xlane.f32.xlu1 %v2677_v9 }
 0xea4   : > { %v2664_v11 = vpop.xlane.xlu0 %2663 }
 0xea5   : > { %v2680_v1 = vmul.f32 0.03125, %v2664_v11 }
 0xea7   : > { %v2686_v3 = vadd.f32 1e-05, %v2680_v1 }
 0xea8   : > { %v2667_v12 = vpop.xlane.xlu1 %2666 }
 0xea9   : > { %3989 = vrsqrt.f32 %v2686_v3  ;;  %v2681_v19 = vmul.f32 0.03125, %v2667_v12 }
 0xeab   : > { %v2687_v21 = vadd.f32 1e-05, %v2681_v19 }
 0xead   : > { %3991 = vrsqrt.f32 %v2687_v21 }
 0xeb4   : > { %v2670_v22 = vpop.xlane.xlu0 %2669 }
 0xeb5   : > { %v2682_v23 = vmul.f32 0.03125, %v2670_v22 }
 0xeb6   : > { %v3990_v25 = vpop.eup %3989 }
 0xeb7   : > { %v2698_v27 = vmul.f32 %v3990_v25, %v2650_v14  ;;  %v2688_v28 = vadd.f32 1e-05, %v2682_v23 }
 0xeb8   : > { %v2673_v30 = vpop.xlane.xlu1 %2672 }
 0xeb9   : > { %3993 = vrsqrt.f32 %v2688_v28  ;;  %v2683_v33 = vmul.f32 0.03125, %v2673_v30  ;;  %v2710_v38 = vmul.f32 %v3445_v32, %v2698_v27 }
 0xeba   : > { %v3992_v35 = vpop.eup %3991 }
 0xebb   : > { %v2699_v36 = vmul.f32 %v3992_v35, %v2651_v29  ;;  %v2689_v37 = vadd.f32 1e-05, %v2683_v33  ;;  %v2722_v47 = vadd.f32 %v3446_v41, %v2710_v38 }
 0xebc   : > { %v2676_v39 = vpop.xlane.xlu0 %2675 }
 0xebd   : > { %3995 = vrsqrt.f32 %v2689_v37  ;;  %v2684_v43 = vmul.f32 0.03125, %v2676_v39  ;;  %v2711_v44 = vmul.f32 %v3445_v32, %v2699_v36 }
 0xebf   : > { %v2690_v45 = vadd.f32 1e-05, %v2684_v43  ;;  %v2723_v49 = vadd.f32 %v3446_v41, %v2711_v44 }
 0xec0   : > { %v2679_v51 = vpop.xlane.xlu1 %2678 }
 0xec1   : > { %3997 = vrsqrt.f32 %v2690_v45  ;;  %v2685_v52 = vmul.f32 0.03125, %v2679_v51  ;;  %v2728_v14 = vpack.c.bf16 %v2723_v49, %v2722_v47 }
 0xec3   : > { %v2691_v24 = vadd.f32 1e-05, %v2685_v52  ;;  %3751 = vmatmul.mubr.msk.bf16.vlgmr.msra.gmra.mxu1 %vm878_vm1, %v2728_v14 }
 0xec4   : > { %3754 = vmatprep.mubr.msk.bf16.mxu1 %vm4106_vm2, %v4105_v50 }
 0xec5   : > { %3999 = vrsqrt.f32 %v2691_v24 }
 0xec6   : > { %v3994_v0 = vpop.eup %3993 }
 0xec7   : > { %v2700_v18 = vmul.f32 %v3994_v0, %v4778_v56 }
 0xec9   : > { %v2712_v20 = vmul.f32 %v3445_v32, %v2700_v18 }
 0xeca   : > { %v3996_v29 = vpop.eup %3995 }
 0xecb   : > { %v2701_v31 = vmul.f32 %v3996_v29, %v4783_v61  ;;  %v2724_v55 = vadd.f32 %v3446_v41, %v2712_v20 }
 0xecd   : > { %v2713_v16 = vmul.f32 %v3445_v32, %v2701_v31 }
 0xece   : > { %v3998_v53 = vpop.eup %3997 }
 0xecf   : > { %v2725_v57 = vadd.f32 %v3446_v41, %v2713_v16  ;;  %v2702_v59 = vmul.f32 %v3998_v53, %v4789_v5  ;;  %v3878_v5 = vld [vmem:[%s4304_s4 + $0x10] sm:$0xff]  }
 0xed0   : > { %3765 = vmatpush3.bf16.msra.mxu0 %v3878_v5 }
 0xed1   : > { %v2729_v60 = vpack.c.bf16 %v2725_v57, %v2724_v55  ;;  %v2714_v2 = vmul.f32 %v3445_v32, %v2702_v59  ;;  %3766 = vmatprep.subr.bf16.mxu0 %v4105_v50 }
 0xed2   : > { %v4000_v62 = vpop.eup %3999 }
 0xed3   : > { %3755 = vmatmul.mubr.msk.bf16.gmra.mxu1 %vm878_vm1, %v2729_v60  ;;  %v2703_v63 = vmul.f32 %v4000_v62, %v2655_v46  ;;  %v2726_v61 = vadd.f32 %v3446_v41, %v2714_v2  ;;  %v3447_v46 = vld [vmem:[%s832_s6] ss:$0 sm:$0xff] }
 0xed4   : > { %3758 = vmatprep.mubr.msk.bf16.mxu1 %vm4106_vm2, %v4105_v50  ;;  %3767 = vmatpush3.bf16.msra.mxu0 %v3879_v42 }
 0xed5   : > { %v2715_v56 = vmul.f32 %v3445_v32, %v2703_v63  ;;  %3768 = vmatprep.subr.bf16.mxu0 %v4105_v50 }
 0xed7   : > { %v2727_v4 = vadd.f32 %v3446_v41, %v2715_v56 }
 0xed8   : > { %3769 = vmatpush3.bf16.msra.mxu0 %v3880_v58 }
 0xed9   : > { %v2730_v6 = vpack.c.bf16 %v2727_v4, %v2726_v61 }
 0xedb   : > { %3759 = vmatmul.mubr.msk.bf16.gmra.mxu1 %vm878_vm1, %v2730_v6 }
 0xf83   : > { %v2797_v54 = vpop.f32.mrf.mxu1 }
 0xf84   : > { %v2798_v8 = vadd.f32 %v3447_v46, %v2797_v54 }
 0xf85   : > { %v3752_v9 = vpop.f32.mrf.mxu1 }
 0xf86   : > { %v2820_v10 = vmul.f32 %v2798_v8, %v2798_v8 }
 0xf87   : > { %v2800_v17 = vpop.f32.mrf.mxu1 }
 0xf88   : > { %v2826_v11 = vmul.f32 %v2820_v10, %v2798_v8  ;;  %v2801_v1 = vadd.f32 %v3447_v46, %v2800_v17 }
 0xf89   : > { %v3753_v3 = vpop.f32.mrf.mxu1 }
 0xf8a   : > { %v2832_v12 = vmul.f32 0.044715, %v2826_v11  ;;  %v2821_v19 = vmul.f32 %v2801_v1, %v2801_v1 }
 0xf8c   : > { %v2838_v21 = vadd.f32 %v2832_v12, %v2798_v8  ;;  %v2827_v22 = vmul.f32 %v2821_v19, %v2801_v1 }
 0xf8e   : > { %v2844_v23 = vmul.f32 0.7978846, %v2838_v21  ;;  %v2833_v25 = vmul.f32 0.044715, %v2827_v22 }
 0xf90   : > { %4001 = vtanh.f32 %v2844_v23  ;;  %v2839_v27 = vadd.f32 %v2833_v25, %v2801_v1 }
 0xf92   : > { %v2845_v28 = vmul.f32 0.7978846, %v2839_v27 }
 0xf93   : > { %v2805_v30 = vpop.f32.mrf.mxu1 }
 0xf94   : > { %4003 = vtanh.f32 %v2845_v28  ;;  %v2806_v32 = vadd.f32 %v3447_v46, %v2805_v30 }
 0xf95   : > { %v3756_v33 = vpop.f32.mrf.mxu1 }
 0xf96   : > { %v2822_v35 = vmul.f32 %v2806_v32, %v2806_v32 }
 0xf97   : > { %v2808_v36 = vpop.f32.mrf.mxu1 }
 0xf98   : > { %v2828_v37 = vmul.f32 %v2822_v35, %v2806_v32  ;;  %v2809_v38 = vadd.f32 %v3447_v46, %v2808_v36 }
 0xf99   : > { %v3757_v39 = vpop.f32.mrf.mxu1 }
 0xf9a   : > { %v2834_v41 = vmul.f32 0.044715, %v2828_v37  ;;  %v2823_v43 = vmul.f32 %v2809_v38, %v2809_v38 }
 0xf9b   : > { %v2813_v44 = vpop.f32.mrf.mxu1 }
 0xf9c   : > { %v2840_v45 = vadd.f32 %v2834_v41, %v2806_v32  ;;  %v2829_v47 = vmul.f32 %v2823_v43, %v2809_v38  ;;  %v2814_v49 = vadd.f32 %v3447_v46, %v2813_v44 }
 0xf9d   : > { %v4002_v51 = vpop.eup %4001  ;;  %v3760_v52 = vpop.f32.mrf.mxu1 }
 0xf9e   : > { %v2856_v14 = vadd.f32 1.0, %v4002_v51  ;;  %v2846_v24 = vmul.f32 0.7978846, %v2840_v45  ;;  %v2835_v0 = vmul.f32 0.044715, %v2829_v47  ;;  %v2824_v18 = vmul.f32 %v2814_v49, %v2814_v49 }
 0xf9f   : > { %v2816_v29 = vpop.f32.mrf.mxu1 }
 0xfa0   : > { %4005 = vtanh.f32 %v2846_v24  ;;  %v2841_v31 = vadd.f32 %v2835_v0, %v2809_v38  ;;  %v2830_v20 = vmul.f32 %v2824_v18, %v2814_v49  ;;  %v2817_v53 = vadd.f32 %v3447_v46, %v2816_v29 }
 0xfa1   : > { %v4004_v16 = vpop.eup %4003  ;;  %v3761_v55 = vpop.f32.mrf.mxu1  ;;  %v2862_v57 = vmul.f32 0.5, %v2856_v14 }
 0xfa2   : > { %v2857_v59 = vadd.f32 1.0, %v4004_v16  ;;  %v2847_v60 = vmul.f32 0.7978846, %v2841_v31  ;;  %v2836_v62 = vmul.f32 0.044715, %v2830_v20  ;;  %v2825_v63 = vmul.f32 %v2817_v53, %v2817_v53 }
 0xfa3   : > { %v2868_v4 = vmul.f32 %v2862_v57, %v2798_v8 }
 0xfa4   : > { %v2863_v2 = vmul.f32 0.5, %v2857_v59  ;;  %4007 = vtanh.f32 %v2847_v60  ;;  %v2842_v56 = vadd.f32 %v2836_v62, %v2814_v49  ;;  %v2831_v61 = vmul.f32 %v2825_v63, %v2817_v53 }
 0xfa6   : > { %v2869_v6 = vmul.f32 %v2863_v2, %v2801_v1  ;;  %v2848_v7 = vmul.f32 0.7978846, %v2842_v56  ;;  %v2837_v5 = vmul.f32 0.044715, %v2831_v61 }
 0xfa8   : > { %v2874_v42 = vpack.c.bf16 %v2869_v6, %v2868_v4  ;;  %4009 = vtanh.f32 %v2848_v7  ;;  %v2843_v58 = vadd.f32 %v2837_v5, %v2817_v53 }
 0xfaa   : > { %3771 = vmatmul.mubr.msk.bf16.vlgmr.msra.gmra.mxu0 %vm2916_vm9, %v2874_v42  ;;  %v2849_v46 = vmul.f32 0.7978846, %v2843_v58 }
 0xfab   : > { %3774 = vmatprep.mubr.msk.bf16.mxu0 %vm4106_vm2, %v4105_v50 }
 0xfac   : > { %4011 = vtanh.f32 %v2849_v46 }
 0xfad   : > { %v4006_v54 = vpop.eup %4005 }
 0xfae   : > { %v2858_v9 = vadd.f32 1.0, %v4006_v54 }
 0xfb0   : > { %v2864_v17 = vmul.f32 0.5, %v2858_v9 }
 0xfb1   : > { %v4008_v10 = vpop.eup %4007 }
 0xfb2   : > { %v2859_v11 = vadd.f32 1.0, %v4008_v10  ;;  %v2870_v3 = vmul.f32 %v2864_v17, %v2806_v32  ;;  %v3453_v32 = vld [vmem:[%s840_s24] ss:$0 sm:$0xff] }
 0xfb4   : > { %v2865_v8 = vmul.f32 0.5, %v2859_v11 }
 0xfb5   : > { %v4010_v1 = vpop.eup %4009 }
 0xfb6   : > { %v2871_v12 = vmul.f32 %v2865_v8, %v2809_v38  ;;  %v2860_v19 = vadd.f32 1.0, %v4010_v1 }
 0xfb8   : > { %v2875_v21 = vpack.c.bf16 %v2871_v12, %v2870_v3  ;;  %v2866_v23 = vmul.f32 0.5, %v2860_v19 }
 0xfb9   : > { %v4012_v22 = vpop.eup %4011 }
 0xfba   : > { %3775 = vmatmul.mubr.msk.bf16.gmra.mxu0 %vm2916_vm9, %v2875_v21  ;;  %v2861_v25 = vadd.f32 1.0, %v4012_v22  ;;  %v2872_v28 = vmul.f32 %v2866_v23, %v2814_v49 }
 0xfbb   : > { %3778 = vmatprep.mubr.msk.bf16.mxu0 %vm4106_vm2, %v4105_v50 }
 0xfbc   : > { %v2867_v27 = vmul.f32 0.5, %v2861_v25 }
 0xfbe   : > { %v2873_v30 = vmul.f32 %v2867_v27, %v2817_v53 }
 0xfc0   : > { %v2876_v33 = vpack.c.bf16 %v2873_v30, %v2872_v28 }
 0xfc2   : > { %3779 = vmatmul.mubr.msk.bf16.gmra.mxu0 %vm2916_vm9, %v2876_v33 }
0x106a   : > { %v2960_v35 = vpop.f32.mrf.mxu0 }
0x106b   : > { %v2961_v36 = vadd.f32 %v3453_v32, %v2960_v35 }
0x106c   : > { %v3772_v37 = vpop.f32.mrf.mxu0 }
0x106d   : > { %v2983_v38 = vadd.f32 %v2961_v36, %v4749_v15 }
0x106e   : > { %v2963_v39 = vpop.f32.mrf.mxu0 }
0x106f   : > { %2989 = vst.msk [vmem:[#allocation2] sm:$0xff] %vm878_vm1, %v2983_v38  ;;  %v2964_v50 = vadd.f32 %v3453_v32, %v2963_v39 }
0x1070   : > { %v3773_v41 = vpop.f32.mrf.mxu0 }
0x1071   : > { %v2984_v43 = vadd.f32 %v2964_v50, %v4753_v13 }
0x1073   : > { %2990 = vst.msk [vmem:[#allocation2 + $0x8] sm:$0xff] %vm878_vm1, %v2984_v43 }
0x107a   : > { %v2968_v44 = vpop.f32.mrf.mxu0 }
0x107b   : > { %v2969_v45 = vadd.f32 %v3453_v32, %v2968_v44 }
0x107c   : > { %v3776_v47 = vpop.f32.mrf.mxu0 }
0x107d   : > { %v2985_v49 = vadd.f32 %v2969_v45, %v4757_v26 }
0x107e   : > { %v2971_v51 = vpop.f32.mrf.mxu0 }
0x107f   : > { %2991 = vst.msk [vmem:[#allocation2 + $0x10] sm:$0xff] %vm878_vm1, %v2985_v49  ;;  %v2972_v52 = vadd.f32 %v3453_v32, %v2971_v51 }
0x1080   : > { %v3777_v14 = vpop.f32.mrf.mxu0 }
0x1081   : > { %v2986_v15 = vadd.f32 %v2972_v52, %v4761_v34 }
0x1082   : > { %v2976_v24 = vpop.f32.mrf.mxu0 }
0x1083   : > { %2992 = vst.msk [vmem:[#allocation2 + $0x18] sm:$0xff] %vm878_vm1, %v2986_v15  ;;  %v2977_v0 = vadd.f32 %v3453_v32, %v2976_v24 }
0x1084   : > { %v3780_v18 = vpop.f32.mrf.mxu0 }
0x1085   : > { %v2987_v13 = vadd.f32 %v2977_v0, %v4765_v40 }
0x1086   : > { %v2979_v29 = vpop.f32.mrf.mxu0 }
0x1087   : > { %2993 = vst.msk [vmem:[#allocation2 + $0x20] sm:$0xff] %vm878_vm1, %v2987_v13  ;;  %v2980_v31 = vadd.f32 %v3453_v32, %v2979_v29  ;;  %2998 = sbr.rel (%p3461_p6) target bundleno = 4750 (0x128e), region = 100 }
0x1088   : > { %v3781_v20 = vpop.f32.mrf.mxu0 }
0x1089   : > { %v2988_v26 = vadd.f32 %v2980_v31, %v4769_v48 }
0x108b   : > { %2994 = vst.msk [vmem:[#allocation2 + $0x28] sm:$0xff] %vm878_vm1, %v2988_v26 }
0x108c   : > { %v3026_v34 = vsel %vm878_vm1, %v2983_v38, 0.0  ;;  %v3029_v16 = vsel %vm878_vm1, %v2986_v15, 0.0  ;;  %v2999_v56 = vpack.c.bf16 %v2983_v38, %v2983_v38  ;;  %v3000_v61 = vpack.c.bf16 %v2986_v15, %v2986_v15  ;;  %v4019_v6 = vld [vmem:[%s4940_s16 + $0x8] sm:$0xff]   ;;  %v4020_v46 = vld [vmem:[%s4940_s16] sm:$0xff]  }
0x108d   : > { %3027 = vadd.xlane.f32.xlu0 %v3026_v34  ;;  %vm3001_vm10 = vcmask 257024   ;;  %v3484_v4 = vpack.c.bf16 %v2984_v43, %v2984_v43  ;;  %v3485_v7 = vpack.c.bf16 %v2985_v49, %v2985_v49  ;;  %v3486_v5 = vpack.c.bf16 %v2987_v13, %v2987_v13  ;;  %v3466_v12 = vld [vmem:[%s4938_s14] ss:$0 sm:$0xff] }
0x108e   : > { %v3487_v42 = vpack.c.bf16 %v2988_v26, %v2988_v26  ;;  %3002 = vst.msk [vmem:[#allocation4] sm:$0xf] %vm3001_vm10, %v2999_v56  ;;  %3003 = vst.msk [vmem:[#allocation4 + $0x4] sm:$0xf] %vm3001_vm10, %v3000_v61  ;;  %v4121_v58 = vmov 0.0   ;;  %vm4122_vm11 = vmmov 0  }
0x108f   : > { %3020 = vst.msk [vmem:[#allocation6] sm:$0xf] %vm3001_vm10, %v3484_v4  ;;  %3782 = vmatprep.subr.bf16.mxu0 %v4121_v58  ;;  %3021 = vst.msk [vmem:[#allocation6 + $0x4] sm:$0xf] %vm3001_vm10, %v3485_v7  ;;  %3786 = vmatprep.mubr.msk.bf16.mxu0 %vm4122_vm11, %v4121_v58  ;;  %v3467_v23 = vld [vmem:[%s4975_s17] ss:$0 sm:$0xff] }
0x1090   : > { %3022 = vst.msk [vmem:[#allocation6 + $0x8] sm:$0xf] %vm3001_vm10, %v3486_v5  ;;  %3023 = vst.msk [vmem:[#allocation6 + $0xc] sm:$0xf] %vm3001_vm10, %v3487_v42  ;;  %3783 = vmatpush3.bf16.msra.mxu0 %v4019_v6  ;;  %v3468_v33 = vld [vmem:[%s4976_s20] ss:$0 sm:$0xff] }
0x1091   : > { %3030 = vadd.xlane.f32.xlu0 %v3029_v16  ;;  %3784 = vmatprep.subr.bf16.mxu0 %v4121_v58  ;;  %vm3136_vm12 = vcmask 31744  }
0x1094   : > { %3785 = vmatpush3.bf16.msra.mxu0 %v4020_v46 }
0x1116   : > { %v3028_v53 = vpop.xlane.xlu0 %3027 }
0x1117   : > { %v3032_v40 = vmul.f32 0.03125, %v3028_v53 }
0x1119   : > { %v3034_v55 = vsub.f32 %v2983_v38, %v3032_v40 }
0x111a   : > { %v3031_v57 = vpop.xlane.xlu0 %3030 }
0x111b   : > { %v3033_v59 = vmul.f32 0.03125, %v3031_v57  ;;  %v3036_v60 = vmul.f32 %v3034_v55, %v3034_v55 }
0x111d   : > { %v3035_v62 = vsub.f32 %v2986_v15, %v3033_v59  ;;  %v3038_v48 = vsel %vm878_vm1, %v3036_v60, 0.0 }
0x111e   : > { %3039 = vadd.xlane.f32.xlu1 %v3038_v48 }
0x111f   : > { %v3037_v63 = vmul.f32 %v3035_v62, %v3035_v62 }
0x1121   : > { %v3041_v2 = vsel %vm878_vm1, %v3037_v63, 0.0 }
0x1122   : > { %3042 = vadd.xlane.f32.xlu1 %v3041_v2 }
0x11a7   : > { %v3040_v54 = vpop.xlane.xlu1 %3039 }
0x11a8   : > { %v3044_v9 = vmul.f32 0.03125, %v3040_v54 }
0x11aa   : > { %v3046_v10 = vadd.f32 1e-05, %v3044_v9 }
0x11ab   : > { %v3043_v17 = vpop.xlane.xlu1 %3042 }
0x11ac   : > { %4021 = vrsqrt.f32 %v3046_v10  ;;  %v3045_v11 = vmul.f32 0.03125, %v3043_v17 }
0x11ae   : > { %v3047_v8 = vadd.f32 1e-05, %v3045_v11 }
0x11b0   : > { %4023 = vrsqrt.f32 %v3047_v8 }
0x11b9   : > { %v4022_v1 = vpop.eup %4021 }
0x11ba   : > { %v3050_v3 = vmul.f32 %v4022_v1, %v3034_v55 }
0x11bc   : > { %v3058_v22 = vmul.f32 %v3466_v12, %v3050_v3 }
0x11bd   : > { %v4024_v19 = vpop.eup %4023 }
0x11be   : > { %v3051_v21 = vmul.f32 %v4024_v19, %v3035_v62  ;;  %v3066_v27 = vadd.f32 %v3467_v23, %v3058_v22 }
0x11c0   : > { %v3059_v25 = vmul.f32 %v3466_v12, %v3051_v21 }
0x11c2   : > { %v3067_v28 = vadd.f32 %v3467_v23, %v3059_v25 }
0x11c4   : > { %v3068_v30 = vpack.c.bf16 %v3067_v28, %v3066_v27 }
0x11c6   : > { %3787 = vmatmul.mubr.msk.bf16.vlgmr.msra.gmra.mxu0 %vm878_vm1, %v3068_v30 }
0x1286   : > { %v3129_v32 = vpop.f32.mrf.mxu0 }
0x1287   : > { %v3130_v35 = vadd.f32 %v3468_v33, %v3129_v32 }
0x1288   : > { %v3788_v36 = vpop.f32.mrf.mxu0 }
0x1289   : > { %3137 = vst.msk [vmem:[%s4977_s23] sm:$0xff] %vm3136_vm12, %v3130_v35 }
0x128a   : > { %v3132_v37 = vpop.f32.mrf.mxu0 }
0x128b   : > { %v3133_v38 = vadd.f32 %v3468_v33, %v3132_v37 }
0x128c   : > { %v3789_v39 = vpop.f32.mrf.mxu0 }
0x128d   : > { %3138 = vst.msk [vmem:[%s4978_s0 + $0x8] sm:$0xff] %vm3136_vm12, %v3133_v38 }
0x128e PF: > { %s4979_s4 = sld [smem:[#allocation11_spill]]  ;;  %s4123_s24 = smov [#allocation4]  }
0x128f   : > { %s3157_s28 = sshll.u32 %s4123_s24, 4  ;;  %s4124_s15 = smov [#allocation6]   ;;  %s3158_s28 = int_to_ptr.vmem [resolvable:$true] %s3157_s28 }
0x1290   : > { %s3174_s19 = sshll.u32 %s4124_s15, 4  ;;  %s4025_s29 = scalar_lea.vmem %s3158_s28, 128  ;;  %s3175_s19 = int_to_ptr.vmem [resolvable:$true] %s3174_s19 }
0x1291   : > { %p4026_p8 = scmp.ne.s32.totalorder %s3158_s28, %s4025_s29  ;;  %p4032_p11 = scmp.lt.s32.totalorder %s3158_s28, %s3158_s28 }
0x1292   : > { %p4033_p12 = scmp.lt.s32.totalorder %s4025_s29, %s4025_s29 }
0x1294   : > { %s4980_s1 = sadd.s32 4294967295, %s4979_s4   ;;  %p4034_p13 = por %p4033_p12, %p4032_p11 }
0x1295   : > { %p4885_p7 = scmp.eq.s32.totalorder %s4980_s1, 1 }
0x1297   : > { %p4027_p9 = pnand %p4026_p8, %p4885_p7 }
0x1299   : > { %p4028_p10 = pneg %p4027_p9 }
0x129b   : > { %p4035_p0 = pnand %p4034_p13, %p4028_p10 }
0x129d   : > { %4038 = shalt.err (!%p4035_p0)
}
0x129e   : > { %s4125_s30 = smov 4   ;;  %s4982_s21 = sld [smem:[#allocation22_spill]] }
0x129f   : > { %s4049_s20 = scalar_lea.vmem %s3175_s19, 256  ;;  %p4056_p4 = scmp.lt.s32.totalorder %s3175_s19, %s3175_s19 }
0x12a0   : > { %p4050_p1 = scmp.ne.s32.totalorder %s3175_s19, %s4049_s20  ;;  %p4057_p5 = scmp.lt.s32.totalorder %s4049_s20, %s4049_s20 }
0x12a2   : > { %p4051_p2 = pnand %p4050_p1, %p4885_p7  ;;  %p4058_p6 = por %p4057_p5, %p4056_p4 }
0x12a4   : > { %3815 = dma.vmem_to_hbm [thread:$0]  (%p4885_p7), %s3158_s28, 128, %s4982_s21, [#allocation5], %s4108_s27, %s4108_s27, %s4125_s30  }
0x12a5   : > { %p4052_p3 = pneg %p4051_p2 }
0x12a7   : > { %p4059_p8 = pnand %p4058_p6, %p4052_p3 }
0x12a9   : > { %4062 = shalt.err (!%p4059_p8)
}
0x12aa   : > { %s4983_s23 = sld [smem:[#allocation23_spill]] }
0x12b0   : > { %3817 = dma.vmem_to_hbm [thread:$0]  (%p4885_p7), %s3175_s19, 256, %s4983_s23, [#allocation7], %s4108_s27, %s4108_s27, %s4125_s30  }
0x12b1   : > { %4086 = dma.done.wait (%p4885_p7), [#allocation5], 128  }
0x12b2   : > { %4088 = vsyncadd (%p4885_p7), [#allocation5], 4294967168 }
0x12b3   : > { %4090 = dma.done.wait (%p4885_p7), [#allocation7], 256  }
0x12b4   : > { %4092 = vsyncadd (%p4885_p7), [#allocation7], 4294967040 }
0x12b5 PF: > { %s4984_s22 = sld [smem:[#allocation11_spill]] }
0x12b6   : > { %s4985_s1 = sld [smem:[#allocation10_spill]] }
0x12bb   : > { %s33_s23 = sadd.s32 1, %s4984_s22   ;;  %s4986_s22 = sld [smem:[#allocation12_spill]] }
0x12bc   : > { %p30_p9 = scmp.ge.s32.totalorder %s33_s23, 4  }
0x12be   :  { %32 = sbr.rel (!%p30_p9) target bundleno = 15 (0xf), region = 185 }
0x12c3   :  { %3202 = vsyncpa [#allocation5], 1 }
0x12c4   :  { %3204 = vsyncpa [#allocation5 + $0x1], 1 }
0x12c5   :  { %3205 = vsyncpa [#allocation7], 1 }

</bundles_post_ra>
